<compile_context>
chip_gen: v7x
topology: tpu7x:2x2x1
jax: 0.10.0
libtpu: 0.0.40
codegen_flags: <defaults>
</compile_context>

<pallas_src>
import functools

import jax
import jax.numpy as jnp
from jax.experimental import pallas as pl
from jax.experimental.pallas import tpu as pltpu


def _round_up(x, m):
    return (x + m - 1) // m * m


def _vmem_capacity_bytes():
    try:
        info = pltpu.get_tpu_info()
        cap = getattr(info, "vmem_capacity_bytes", None)
        if cap:
            return int(cap)
    except Exception:
        pass
    return 64 << 20  # conservative fallback (v7x per-TC VMEM)


# ---------------------------------------------------------------------------
# Resident-weight kernel: full (L, Dp, Dp) stack in VMEM, fetched once.
# ---------------------------------------------------------------------------
def _dbl_fc_resident_kernel(x_ref, w_ref, o_ref, *scratch, depth, dbl):
    mask_ref = scratch[0] if scratch else None
    cdt = x_ref.dtype

    x = x_ref[...]
    out = x
    # Forward chain: out = relu(out @ W_k^T)   [F.linear(x, W) == x @ W^T]
    # NOTE: the rhs-transposed contraction ((1,),(1,)) is fed to the MXU as-is;
    # pre-transposing W would only move the transposed orientation onto the
    # replay matmuls, so a single resident copy of W is kept.
    # TODO(synk): switch these unrolled layer loops to lax.fori_loop when depth
    # is large (>~8) to bound live ranges / compile time.
    for k in range(depth - 1):
        acc = jax.lax.dot_general(
            out, w_ref[k], (((1,), (1,)), ((), ())),
            preferred_element_type=jnp.float32)
        acc = jnp.maximum(acc, 0.0)
        if dbl:
            mask_ref[k] = (acc > 0.0).astype(mask_ref.dtype)
        out = acc.astype(cdt)
    out = jax.lax.dot_general(
        out, w_ref[depth - 1], (((1,), (1,)), ((), ())),
        preferred_element_type=jnp.float32)

    if dbl:
        # Transposed replay: out_t = (out_t @ W_k) * mask_k, then @ W_0 once more.
        out_t = x
        for k in range(depth - 2, -1, -1):
            acc_t = jax.lax.dot_general(
                out_t, w_ref[k], (((1,), (0,)), ((), ())),
                preferred_element_type=jnp.float32)
            acc_t = acc_t * mask_ref[k].astype(jnp.float32)
            out_t = acc_t.astype(cdt)
        out_t = jax.lax.dot_general(
            out_t, w_ref[0], (((1,), (0,)), ((), ())),
            preferred_element_type=jnp.float32)
        o_ref[...] = (out + out_t).astype(o_ref.dtype)
    else:
        o_ref[...] = out.astype(o_ref.dtype)


# ---------------------------------------------------------------------------
# Streaming kernel: weights in HBM, one layer at a time, manual double buffer.
# ---------------------------------------------------------------------------
def _dbl_fc_stream_kernel(x_ref, w_hbm, o_ref, w_buf, sem, *scratch, depth, dbl):
    mask_ref = scratch[0] if scratch else None
    cdt = x_ref.dtype

    def fetch(layer, slot):
        pltpu.make_async_copy(w_hbm.at[layer], w_buf.at[slot], sem.at[slot]).start()

    def wait(slot):
        # Same byte-count for every layer, so any source slice works for wait().
        pltpu.make_async_copy(w_hbm.at[0], w_buf.at[slot], sem.at[slot]).wait()

    # Layer schedule: forward 0..L-1, then (if dbl) replay L-2..0 and W_0 again.
    seq = list(range(depth))
    if dbl:
        seq += list(range(depth - 2, -1, -1)) + [0]
    n = len(seq)

    fetch(seq[0], 0)
    x = x_ref[...]
    out = x
    out_t = x
    out_fwd = None
    for i, layer in enumerate(seq):
        slot = i & 1
        wait(slot)
        if i + 1 < n:
            fetch(seq[i + 1], 1 - slot)   # prefetch next layer into the other slot
        w = w_buf[slot]
        if i < depth:                     # ---- forward chain ----
            acc = jax.lax.dot_general(
                out, w, (((1,), (1,)), ((), ())),
                preferred_element_type=jnp.float32)
            if i < depth - 1:
                acc = jnp.maximum(acc, 0.0)
                if dbl:
                    mask_ref[i] = (acc > 0.0).astype(mask_ref.dtype)
                out = acc.astype(cdt)
            else:
                out_fwd = acc
        else:                             # ---- transposed replay ----
            acc_t = jax.lax.dot_general(
                out_t, w, (((1,), (0,)), ((), ())),
                preferred_element_type=jnp.float32)
            if i < n - 1:
                acc_t = acc_t * mask_ref[layer].astype(jnp.float32)
                out_t = acc_t.astype(cdt)
            else:
                o_ref[...] = (out_fwd + acc_t).astype(o_ref.dtype)
    if not dbl:
        o_ref[...] = out_fwd.astype(o_ref.dtype)


# ---------------------------------------------------------------------------
# Wrapper
# ---------------------------------------------------------------------------
def prepare_weights(weights, compute_dtype=jnp.bfloat16):
    """One-time weight prep (cast + lane pad) to keep it out of the hot path."""
    L, D, D2 = weights.shape
    assert D == D2
    Dp = max(_round_up(D, 128), 128)
    w = weights.astype(compute_dtype)
    if Dp != D:
        w = jnp.pad(w, ((0, 0), (0, Dp - D), (0, Dp - D)))
    return w


def dbl_fc_forward(x, weights, *, dbl=True, compute_dtype=jnp.bfloat16,
                   block_b=256, weight_streaming=None):
    """x: (B, 1, H, W); weights: (L, D, D) or pre-prepared (L, Dp, Dp)."""
    B = x.shape[0]
    D = x.shape[1] * x.shape[2] * x.shape[3]
    out_dtype = x.dtype
    L = weights.shape[0]
    assert L >= 1
    Dp = max(_round_up(D, 128), 128)
    assert weights.shape[1] == weights.shape[2] and weights.shape[1] in (D, Dp)

    # Weight prep (no-op if prepare_weights() was already used by the caller).
    w = weights
    if w.shape[1] != Dp:
        w = jnp.pad(w, ((0, 0), (0, Dp - D), (0, Dp - D)))
    if w.dtype != compute_dtype:
        w = w.astype(compute_dtype)

    x2d = x.reshape(B, D).astype(compute_dtype)
    if Dp != D:
        x2d = jnp.pad(x2d, ((0, 0), (0, Dp - D)))

    # Batch tiling: >=2 tiles whenever B is big enough so v7x's two TensorCores
    # both get work (verify sharding in a trace; plain "parallel" is used here).
    if B > block_b:
        tb = block_b
    elif B >= 16:
        tb = max(_round_up(pl.cdiv(B, 2), 8), 8)
    else:
        tb = B  # tiny batch: one full-B tile (block == full array dim is legal)

    c_item = jnp.dtype(compute_dtype).itemsize
    o_item = jnp.dtype(out_dtype).itemsize
    use_mask = dbl and L > 1
    resident_w_bytes = L * Dp * Dp * c_item   # single-buffered resident stack
    stream_w_bytes = 2 * Dp * Dp * c_item     # manual per-layer double buffer

    def _budget(tb_, w_bytes):
        mask_b = (L - 1) * tb_ * Dp * 2 if use_mask else 0
        io_b = 2 * tb_ * Dp * (c_item + o_item)   # pipelined x / out tiles
        act_b = 8 * tb_ * Dp * 4                  # f32 temporaries headroom
        return w_bytes + mask_b + io_b + act_b + (2 << 20)

    cap = int(0.85 * _vmem_capacity_bytes())
    if weight_streaming is None:
        weight_streaming = _budget(tb, resident_w_bytes) > cap
    if weight_streaming:
        while tb > 8 and _budget(tb, stream_w_bytes) > cap:
            tb = max(tb // 2, 8)

    bp = _round_up(B, tb)
    if bp != B:
        x2d = jnp.pad(x2d, ((0, bp - B), (0, 0)))
    grid = (bp // tb,)

    scratch_shapes = []
    if weight_streaming:
        scratch_shapes += [pltpu.VMEM((2, Dp, Dp), compute_dtype),
                           pltpu.SemaphoreType.DMA((2,))]
    if use_mask:
        # bf16 masks (int8 would halve this if VMEM gets tight at large L/Dp).
        scratch_shapes += [pltpu.VMEM((L - 1, tb, Dp), jnp.bfloat16)]

    need = _budget(tb, stream_w_bytes if weight_streaming else resident_w_bytes)
    phys = _vmem_capacity_bytes()
    vmem_limit = int(min(max(int(1.15 * need), 32 << 20), int(0.9 * phys)))

    n_mm = (2 * L) if dbl else L
    w_read_bytes = (grid[0] * n_mm if weight_streaming else L) * Dp * Dp * c_item
    cost = pl.CostEstimate(
        flops=2 * n_mm * bp * Dp * Dp,
        transcendentals=0,
        bytes_accessed=w_read_bytes + bp * Dp * (c_item + o_item))

    x_spec = pl.BlockSpec((tb, Dp), lambda i: (i, 0))
    out_spec = pl.BlockSpec((tb, Dp), lambda i: (i, 0))

    def _run(w_spec, kernel_fn, vlimit):
        return pl.pallas_call(
            kernel_fn,
            out_shape=jax.ShapeDtypeStruct((bp, Dp), out_dtype),
            grid=grid,
            in_specs=[x_spec, w_spec],
            out_specs=out_spec,
            scratch_shapes=scratch_shapes,
            compiler_params=pltpu.CompilerParams(
                dimension_semantics=("parallel",),
                vmem_limit_bytes=vlimit),
            cost_estimate=cost,
        )(x2d, w)

    if weight_streaming:
        kernel_fn = functools.partial(_dbl_fc_stream_kernel, depth=L, dbl=dbl)
        out2d = _run(pl.BlockSpec(memory_space=pl.ANY), kernel_fn, vmem_limit)
    else:
        kernel_fn = functools.partial(_dbl_fc_resident_kernel, depth=L, dbl=dbl)
        try:
            # Constant index_map -> the stack is DMA'd once; single-buffer it so
            # only one (L, Dp, Dp) copy is resident instead of two.
            w_spec = pl.BlockSpec((L, Dp, Dp), lambda i: (0, 0, 0),
                                  pipeline_mode=pl.Buffered(1))
            out2d = _run(w_spec, kernel_fn, vmem_limit)
        except Exception:
            # Fallback for JAX versions without single-buffer pipeline_mode:
            # default double-buffered resident stack (budget grows accordingly).
            vlimit2 = int(min(max(vmem_limit + resident_w_bytes, 32 << 20),
                              int(0.9 * phys)))
            out2d = _run(pl.BlockSpec((L, Dp, Dp), lambda i: (0, 0, 0)),
                         kernel_fn, vlimit2)

    if bp != B or Dp != D:
        out2d = out2d[:B, :D]
    return out2d.reshape(x.shape)


# ---------------------------------------------------------------------------
# Reference / init helpers
# ---------------------------------------------------------------------------
def make_weights(input_size, layers, dtype=jnp.float32):
    """Matches dbl_FC.__init__: eye(D) * (0.001 if i==0 else 1)."""
    d = input_size * input_size
    ws = [jnp.eye(d, dtype=dtype) * (0.001 if i == 0 else 1.0) for i in range(layers)]
    return jnp.stack(ws, axis=0)  # (L, D, D)


def ref_forward(x, weights, *, dbl=True):
    """Pure-JAX f32 reference with identical semantics to the PyTorch forward."""
    B = x.shape[0]
    L = weights.shape[0]
    out = x.reshape(B, -1)
    out_t = out
    masks = []
    for k in range(L - 1):
        out = jnp.maximum(out @ weights[k].T, 0.0)
        masks.append((out != 0.0).astype(out.dtype))
    out = out @ weights[L - 1].T
    if dbl:
        for k in range(L - 2, -1, -1):
            out_t = (out_t @ weights[k]) * masks.pop()
        out_t = out_t @ weights[0]
        return (out + out_t).reshape(x.shape)
    return out.reshape(x.shape)


if __name__ == "__main__":
    input_size = 16        # -> D = 256
    layers = 3
    batch = 2

    key = jax.random.PRNGKey(0)
    x = jax.random.normal(key, (batch, 1, input_size, input_size), dtype=jnp.float32)
    weights = make_weights(input_size, layers)            # f32 (L, D, D)
    w_bf16 = prepare_weights(weights, jnp.bfloat16)       # one-time cast (hoisted)
    expected = ref_forward(x, weights, dbl=True)

    # Resident-weight path, bf16 MXU inputs / f32 accumulation.
    out_bf16 = jax.block_until_ready(dbl_fc_forward(x, w_bf16, dbl=True))
    assert out_bf16.shape == x.shape
    assert jnp.allclose(out_bf16, expected, atol=1e-3, rtol=2e-2), "bf16 resident mismatch"

    # f32 compute path: parity with the f32 PyTorch module's arithmetic.
    out_f32 = jax.block_until_ready(
        dbl_fc_forward(x, weights, dbl=True, compute_dtype=jnp.float32))
    assert jnp.allclose(out_f32, expected, atol=1e-4, rtol=1e-4), "f32 resident mismatch"

    # Weight-streaming path (auto-selected when L*Dp^2 exceeds the VMEM budget);
    # forced here at small shape so it stays verified.
    out_stream = jax.block_until_ready(
        dbl_fc_forward(x, w_bf16, dbl=True, weight_streaming=True))
    assert jnp.allclose(out_stream, expected, atol=1e-3, rtol=2e-2), "streaming mismatch"

    # dbl=False branch.
    expected_nd = ref_forward(x, weights, dbl=False)
    out_nd = jax.block_until_ready(dbl_fc_forward(x, w_bf16, dbl=False))
    assert jnp.allclose(out_nd, expected_nd, atol=1e-3, rtol=2e-2), "dbl=False mismatch"

    print("KERNEL_OK")
</pallas_src>

<mosaic_0001>
module attributes {stable_mosaic.version = 11 : i64} {
  func.func @_dbl_fc_resident_kernel(%arg0: i32, %arg1: memref<2x256xbf16, #tpu.memory_space<vmem>>, %arg2: memref<3x256x256xbf16, #tpu.memory_space<vmem>>, %arg3: memref<2x256xf32, #tpu.memory_space<vmem>>, %arg4: memref<2x2x256xbf16, #tpu.memory_space<vmem>>) attributes {dimension_semantics = [#tpu.dimension_semantics<parallel>], iteration_bounds = array<i64: 1>, scalar_prefetch = 0 : i64, scratch_operands = 1 : i64, tpu.core_type = #tpu.core_type<tc>, window_params = [{transform_indices = @transform_0, window_bounds = array<i64: 2, 256>}, {pipeline_mode = #tpu.pipeline_mode<synchronous>, transform_indices = @transform_1, window_bounds = array<i64: 3, 256, 256>}, {transform_indices = @transform_2, window_bounds = array<i64: 2, 256>}]} {
    %c0 = arith.constant 0 : index
    %c0_0 = arith.constant 0 : index
    %0 = vector.load %arg1[%c0, %c0_0] : memref<2x256xbf16, #tpu.memory_space<vmem>>, vector<2x256xbf16>
    %c0_1 = arith.constant 0 : index
    %c0_2 = arith.constant 0 : index
    %c0_3 = arith.constant 0 : index
    %1 = vector.load %arg2[%c0_1, %c0_2, %c0_3] : memref<3x256x256xbf16, #tpu.memory_space<vmem>>, vector<1x256x256xbf16>
    %2 = vector.shape_cast %1 : vector<1x256x256xbf16> to vector<256x256xbf16>
    %cst = arith.constant dense<0.000000e+00> : vector<2x256xf32>
    %3 = tpu.matmul %0, %2, %cst {dimension_numbers = #tpu.dot_dimension_numbers<[1], [1], [0], [0], [0, 0, 1, 0], [], []>} : vector<2x256xbf16>, vector<256x256xbf16>, vector<2x256xf32> -> vector<2x256xf32>
    %cst_4 = arith.constant 0.000000e+00 : f32
    %4 = vector.broadcast %cst_4 : f32 to vector<2x256xf32>
    %5 = arith.maximumf %3, %4 : vector<2x256xf32>
    %cst_5 = arith.constant 0.000000e+00 : f32
    %6 = vector.broadcast %cst_5 : f32 to vector<2x256xf32>
    %7 = arith.cmpf ogt, %5, %6 : vector<2x256xf32>
    %8 = arith.extui %7 : vector<2x256xi1> to vector<2x256xi32>
    %9 = arith.sitofp %8 : vector<2x256xi32> to vector<2x256xf32>
    %10 = arith.truncf %9 : vector<2x256xf32> to vector<2x256xbf16>
    %c0_6 = arith.constant 0 : index
    %c0_7 = arith.constant 0 : index
    %c0_8 = arith.constant 0 : index
    %11 = vector.load %arg4[%c0_6, %c0_7, %c0_8] : memref<2x2x256xbf16, #tpu.memory_space<vmem>>, vector<1x2x256xbf16>
    %12 = vector.shape_cast %11 : vector<1x2x256xbf16> to vector<2x256xbf16>
    %13 = vector.shape_cast %10 : vector<2x256xbf16> to vector<1x2x256xbf16>
    tpu.vector_store %arg4[%c0_6, %c0_7, %c0_8], %13 {strides = array<i32>} : memref<2x2x256xbf16, #tpu.memory_space<vmem>>, vector<1x2x256xbf16>,
    %14 = arith.truncf %5 : vector<2x256xf32> to vector<2x256xbf16>
    %c1 = arith.constant 1 : index
    %c0_9 = arith.constant 0 : index
    %c0_10 = arith.constant 0 : index
    %15 = vector.load %arg2[%c1, %c0_9, %c0_10] : memref<3x256x256xbf16, #tpu.memory_space<vmem>>, vector<1x256x256xbf16>
    %16 = vector.shape_cast %15 : vector<1x256x256xbf16> to vector<256x256xbf16>
    %cst_11 = arith.constant dense<0.000000e+00> : vector<2x256xf32>
    %17 = tpu.matmul %14, %16, %cst_11 {dimension_numbers = #tpu.dot_dimension_numbers<[1], [1], [0], [0], [0, 0, 1, 0], [], []>} : vector<2x256xbf16>, vector<256x256xbf16>, vector<2x256xf32> -> vector<2x256xf32>
    %cst_12 = arith.constant 0.000000e+00 : f32
    %18 = vector.broadcast %cst_12 : f32 to vector<2x256xf32>
    %19 = arith.maximumf %17, %18 : vector<2x256xf32>
    %cst_13 = arith.constant 0.000000e+00 : f32
    %20 = vector.broadcast %cst_13 : f32 to vector<2x256xf32>
    %21 = arith.cmpf ogt, %19, %20 : vector<2x256xf32>
    %22 = arith.extui %21 : vector<2x256xi1> to vector<2x256xi32>
    %23 = arith.sitofp %22 : vector<2x256xi32> to vector<2x256xf32>
    %24 = arith.truncf %23 : vector<2x256xf32> to vector<2x256xbf16>
    %c1_14 = arith.constant 1 : index
    %c0_15 = arith.constant 0 : index
    %c0_16 = arith.constant 0 : index
    %25 = vector.load %arg4[%c1_14, %c0_15, %c0_16] : memref<2x2x256xbf16, #tpu.memory_space<vmem>>, vector<1x2x256xbf16>
    %26 = vector.shape_cast %25 : vector<1x2x256xbf16> to vector<2x256xbf16>
    %27 = vector.shape_cast %24 : vector<2x256xbf16> to vector<1x2x256xbf16>
    tpu.vector_store %arg4[%c1_14, %c0_15, %c0_16], %27 {strides = array<i32>} : memref<2x2x256xbf16, #tpu.memory_space<vmem>>, vector<1x2x256xbf16>,
    %28 = arith.truncf %19 : vector<2x256xf32> to vector<2x256xbf16>
    %c2 = arith.constant 2 : index
    %c0_17 = arith.constant 0 : index
    %c0_18 = arith.constant 0 : index
    %29 = vector.load %arg2[%c2, %c0_17, %c0_18] : memref<3x256x256xbf16, #tpu.memory_space<vmem>>, vector<1x256x256xbf16>
    %30 = vector.shape_cast %29 : vector<1x256x256xbf16> to vector<256x256xbf16>
    %cst_19 = arith.constant dense<0.000000e+00> : vector<2x256xf32>
    %31 = tpu.matmul %28, %30, %cst_19 {dimension_numbers = #tpu.dot_dimension_numbers<[1], [1], [0], [0], [0, 0, 1, 0], [], []>} : vector<2x256xbf16>, vector<256x256xbf16>, vector<2x256xf32> -> vector<2x256xf32>
    %c1_20 = arith.constant 1 : index
    %c0_21 = arith.constant 0 : index
    %c0_22 = arith.constant 0 : index
    %32 = vector.load %arg2[%c1_20, %c0_21, %c0_22] : memref<3x256x256xbf16, #tpu.memory_space<vmem>>, vector<1x256x256xbf16>
    %33 = vector.shape_cast %32 : vector<1x256x256xbf16> to vector<256x256xbf16>
    %cst_23 = arith.constant dense<0.000000e+00> : vector<2x256xf32>
    %34 = tpu.matmul %0, %33, %cst_23 {dimension_numbers = #tpu.dot_dimension_numbers<[1], [0], [0], [1], [0, 0, 1, 1], [], []>} : vector<2x256xbf16>, vector<256x256xbf16>, vector<2x256xf32> -> vector<2x256xf32>
    %c1_24 = arith.constant 1 : index
    %c0_25 = arith.constant 0 : index
    %c0_26 = arith.constant 0 : index
    %35 = vector.load %arg4[%c1_24, %c0_25, %c0_26] : memref<2x2x256xbf16, #tpu.memory_space<vmem>>, vector<1x2x256xbf16>
    %36 = vector.shape_cast %35 : vector<1x2x256xbf16> to vector<2x256xbf16>
    %37 = arith.extf %36 : vector<2x256xbf16> to vector<2x256xf32>
    %38 = arith.mulf %34, %37 : vector<2x256xf32>
    %39 = arith.truncf %38 : vector<2x256xf32> to vector<2x256xbf16>
    %c0_27 = arith.constant 0 : index
    %c0_28 = arith.constant 0 : index
    %c0_29 = arith.constant 0 : index
    %40 = vector.load %arg2[%c0_27, %c0_28, %c0_29] : memref<3x256x256xbf16, #tpu.memory_space<vmem>>, vector<1x256x256xbf16>
    %41 = vector.shape_cast %40 : vector<1x256x256xbf16> to vector<256x256xbf16>
    %cst_30 = arith.constant dense<0.000000e+00> : vector<2x256xf32>
    %42 = tpu.matmul %39, %41, %cst_30 {dimension_numbers = #tpu.dot_dimension_numbers<[1], [0], [0], [1], [0, 0, 1, 1], [], []>} : vector<2x256xbf16>, vector<256x256xbf16>, vector<2x256xf32> -> vector<2x256xf32>
    %c0_31 = arith.constant 0 : index
    %c0_32 = arith.constant 0 : index
    %c0_33 = arith.constant 0 : index
    %43 = vector.load %arg4[%c0_31, %c0_32, %c0_33] : memref<2x2x256xbf16, #tpu.memory_space<vmem>>, vector<1x2x256xbf16>
    %44 = vector.shape_cast %43 : vector<1x2x256xbf16> to vector<2x256xbf16>
    %45 = arith.extf %44 : vector<2x256xbf16> to vector<2x256xf32>
    %46 = arith.mulf %42, %45 : vector<2x256xf32>
    %47 = arith.truncf %46 : vector<2x256xf32> to vector<2x256xbf16>
    %c0_34 = arith.constant 0 : index
    %c0_35 = arith.constant 0 : index
    %c0_36 = arith.constant 0 : index
    %48 = vector.load %arg2[%c0_34, %c0_35, %c0_36] : memref<3x256x256xbf16, #tpu.memory_space<vmem>>, vector<1x256x256xbf16>
    %49 = vector.shape_cast %48 : vector<1x256x256xbf16> to vector<256x256xbf16>
    %cst_37 = arith.constant dense<0.000000e+00> : vector<2x256xf32>
    %50 = tpu.matmul %47, %49, %cst_37 {dimension_numbers = #tpu.dot_dimension_numbers<[1], [0], [0], [1], [0, 0, 1, 1], [], []>} : vector<2x256xbf16>, vector<256x256xbf16>, vector<2x256xf32> -> vector<2x256xf32>
    %51 = arith.addf %31, %50 : vector<2x256xf32>
    %c0_38 = arith.constant 0 : index
    %c0_39 = arith.constant 0 : index
    %52 = vector.load %arg3[%c0_38, %c0_39] : memref<2x256xf32, #tpu.memory_space<vmem>>, vector<2x256xf32>
    tpu.vector_store %arg3[%c0_38, %c0_39], %51 {strides = array<i32>} : memref<2x256xf32, #tpu.memory_space<vmem>>, vector<2x256xf32>,
    return
  }
  func.func @transform_0(%arg0: i32) -> (i32, i32) {
    %c0_i32 = arith.constant 0 : i32
    %c0_i32_0 = arith.constant 0 : i32
    return %arg0, %c0_i32 : i32, i32
  }
  func.func @transform_1(%arg0: i32) -> (i32, i32, i32) {
    %c0_i32 = arith.constant 0 : i32
    %c0_i32_0 = arith.constant 0 : i32
    %c0_i32_1 = arith.constant 0 : i32
    %c0_i32_2 = arith.constant 0 : i32
    return %c0_i32, %c0_i32_0, %c0_i32_1 : i32, i32, i32
  }
  func.func @transform_2(%arg0: i32) -> (i32, i32) {
    %c0_i32 = arith.constant 0 : i32
    %c0_i32_0 = arith.constant 0 : i32
    return %arg0, %c0_i32 : i32, i32
  }
}

module attributes {stable_mosaic.version = 11 : i64} {
  func.func @_dbl_fc_resident_kernel(%arg0: i32, %arg1: memref<2x256xbf16, #tpu.memory_space<vmem>>, %arg2: memref<3x256x256xbf16, #tpu.memory_space<vmem>>, %arg3: memref<2x256xf32, #tpu.memory_space<vmem>>, %arg4: memref<2x2x256xbf16, #tpu.memory_space<vmem>>) attributes {dimension_semantics = [#tpu.dimension_semantics<parallel>], iteration_bounds = array<i64: 1>, scalar_prefetch = 0 : i64, scratch_operands = 1 : i64, tpu.core_type = #tpu.core_type<tc>, window_params = [{transform_indices = @transform_0, window_bounds = array<i64: 2, 256>}, {pipeline_mode = #tpu.pipeline_mode<synchronous>, transform_indices = @transform_1, window_bounds = array<i64: 3, 256, 256>}, {transform_indices = @transform_2, window_bounds = array<i64: 2, 256>}]} {
    %c0 = arith.constant 0 : index
    %c0_0 = arith.constant 0 : index
    %0 = vector.load %arg1[%c0, %c0_0] : memref<2x256xbf16, #tpu.memory_space<vmem>>, vector<2x256xbf16>
    %c0_1 = arith.constant 0 : index
    %c0_2 = arith.constant 0 : index
    %c0_3 = arith.constant 0 : index
    %1 = vector.load %arg2[%c0_1, %c0_2, %c0_3] : memref<3x256x256xbf16, #tpu.memory_space<vmem>>, vector<1x256x256xbf16>
    %2 = vector.shape_cast %1 : vector<1x256x256xbf16> to vector<256x256xbf16>
    %cst = arith.constant dense<0.000000e+00> : vector<2x256xf32>
    %3 = tpu.matmul %0, %2, %cst {dimension_numbers = #tpu.dot_dimension_numbers<[1], [1], [0], [0], [0, 0, 1, 0], [], []>} : vector<2x256xbf16>, vector<256x256xbf16>, vector<2x256xf32> -> vector<2x256xf32>
    %cst_4 = arith.constant 0.000000e+00 : f32
    %4 = vector.broadcast %cst_4 : f32 to vector<2x256xf32>
    %5 = arith.maximumf %3, %4 : vector<2x256xf32>
    %cst_5 = arith.constant 0.000000e+00 : f32
    %6 = vector.broadcast %cst_5 : f32 to vector<2x256xf32>
    %7 = arith.cmpf ogt, %5, %6 : vector<2x256xf32>
    %8 = arith.extui %7 : vector<2x256xi1> to vector<2x256xi32>
    %9 = arith.sitofp %8 : vector<2x256xi32> to vector<2x256xf32>
    %10 = arith.truncf %9 : vector<2x256xf32> to vector<2x256xbf16>
    %c0_6 = arith.constant 0 : index
    %c0_7 = arith.constant 0 : index
    %c0_8 = arith.constant 0 : index
    %11 = vector.load %arg4[%c0_6, %c0_7, %c0_8] : memref<2x2x256xbf16, #tpu.memory_space<vmem>>, vector<1x2x256xbf16>
    %12 = vector.shape_cast %11 : vector<1x2x256xbf16> to vector<2x256xbf16>
    %13 = vector.shape_cast %10 : vector<2x256xbf16> to vector<1x2x256xbf16>
    tpu.vector_store %arg4[%c0_6, %c0_7, %c0_8], %13 {strides = array<i32>} : memref<2x2x256xbf16, #tpu.memory_space<vmem>>, vector<1x2x256xbf16>,
    %14 = arith.truncf %5 : vector<2x256xf32> to vector<2x256xbf16>
    %c1 = arith.constant 1 : index
    %c0_9 = arith.constant 0 : index
    %c0_10 = arith.constant 0 : index
    %15 = vector.load %arg2[%c1, %c0_9, %c0_10] : memref<3x256x256xbf16, #tpu.memory_space<vmem>>, vector<1x256x256xbf16>
    %16 = vector.shape_cast %15 : vector<1x256x256xbf16> to vector<256x256xbf16>
    %cst_11 = arith.constant dense<0.000000e+00> : vector<2x256xf32>
    %17 = tpu.matmul %14, %16, %cst_11 {dimension_numbers = #tpu.dot_dimension_numbers<[1], [1], [0], [0], [0, 0, 1, 0], [], []>} : vector<2x256xbf16>, vector<256x256xbf16>, vector<2x256xf32> -> vector<2x256xf32>
    %cst_12 = arith.constant 0.000000e+00 : f32
    %18 = vector.broadcast %cst_12 : f32 to vector<2x256xf32>
    %19 = arith.maximumf %17, %18 : vector<2x256xf32>
    %cst_13 = arith.constant 0.000000e+00 : f32
    %20 = vector.broadcast %cst_13 : f32 to vector<2x256xf32>
    %21 = arith.cmpf ogt, %19, %20 : vector<2x256xf32>
    %22 = arith.extui %21 : vector<2x256xi1> to vector<2x256xi32>
    %23 = arith.sitofp %22 : vector<2x256xi32> to vector<2x256xf32>
    %24 = arith.truncf %23 : vector<2x256xf32> to vector<2x256xbf16>
    %c1_14 = arith.constant 1 : index
    %c0_15 = arith.constant 0 : index
    %c0_16 = arith.constant 0 : index
    %25 = vector.load %arg4[%c1_14, %c0_15, %c0_16] : memref<2x2x256xbf16, #tpu.memory_space<vmem>>, vector<1x2x256xbf16>
    %26 = vector.shape_cast %25 : vector<1x2x256xbf16> to vector<2x256xbf16>
    %27 = vector.shape_cast %24 : vector<2x256xbf16> to vector<1x2x256xbf16>
    tpu.vector_store %arg4[%c1_14, %c0_15, %c0_16], %27 {strides = array<i32>} : memref<2x2x256xbf16, #tpu.memory_space<vmem>>, vector<1x2x256xbf16>,
    %28 = arith.truncf %19 : vector<2x256xf32> to vector<2x256xbf16>
    %c2 = arith.constant 2 : index
    %c0_17 = arith.constant 0 : index
    %c0_18 = arith.constant 0 : index
    %29 = vector.load %arg2[%c2, %c0_17, %c0_18] : memref<3x256x256xbf16, #tpu.memory_space<vmem>>, vector<1x256x256xbf16>
    %30 = vector.shape_cast %29 : vector<1x256x256xbf16> to vector<256x256xbf16>
    %cst_19 = arith.constant dense<0.000000e+00> : vector<2x256xf32>
    %31 = tpu.matmul %28, %30, %cst_19 {dimension_numbers = #tpu.dot_dimension_numbers<[1], [1], [0], [0], [0, 0, 1, 0], [], []>} : vector<2x256xbf16>, vector<256x256xbf16>, vector<2x256xf32> -> vector<2x256xf32>
    %c1_20 = arith.constant 1 : index
    %c0_21 = arith.constant 0 : index
    %c0_22 = arith.constant 0 : index
    %32 = vector.load %arg2[%c1_20, %c0_21, %c0_22] : memref<3x256x256xbf16, #tpu.memory_space<vmem>>, vector<1x256x256xbf16>
    %33 = vector.shape_cast %32 : vector<1x256x256xbf16> to vector<256x256xbf16>
    %cst_23 = arith.constant dense<0.000000e+00> : vector<2x256xf32>
    %34 = tpu.matmul %0, %33, %cst_23 {dimension_numbers = #tpu.dot_dimension_numbers<[1], [0], [0], [1], [0, 0, 1, 1], [], []>} : vector<2x256xbf16>, vector<256x256xbf16>, vector<2x256xf32> -> vector<2x256xf32>
    %c1_24 = arith.constant 1 : index
    %c0_25 = arith.constant 0 : index
    %c0_26 = arith.constant 0 : index
    %35 = vector.load %arg4[%c1_24, %c0_25, %c0_26] : memref<2x2x256xbf16, #tpu.memory_space<vmem>>, vector<1x2x256xbf16>
    %36 = vector.shape_cast %35 : vector<1x2x256xbf16> to vector<2x256xbf16>
    %37 = arith.extf %36 : vector<2x256xbf16> to vector<2x256xf32>
    %38 = arith.mulf %34, %37 : vector<2x256xf32>
    %39 = arith.truncf %38 : vector<2x256xf32> to vector<2x256xbf16>
    %c0_27 = arith.constant 0 : index
    %c0_28 = arith.constant 0 : index
    %c0_29 = arith.constant 0 : index
    %40 = vector.load %arg2[%c0_27, %c0_28, %c0_29] : memref<3x256x256xbf16, #tpu.memory_space<vmem>>, vector<1x256x256xbf16>
    %41 = vector.shape_cast %40 : vector<1x256x256xbf16> to vector<256x256xbf16>
    %cst_30 = arith.constant dense<0.000000e+00> : vector<2x256xf32>
    %42 = tpu.matmul %39, %41, %cst_30 {dimension_numbers = #tpu.dot_dimension_numbers<[1], [0], [0], [1], [0, 0, 1, 1], [], []>} : vector<2x256xbf16>, vector<256x256xbf16>, vector<2x256xf32> -> vector<2x256xf32>
    %c0_31 = arith.constant 0 : index
    %c0_32 = arith.constant 0 : index
    %c0_33 = arith.constant 0 : index
    %43 = vector.load %arg4[%c0_31, %c0_32, %c0_33] : memref<2x2x256xbf16, #tpu.memory_space<vmem>>, vector<1x2x256xbf16>
    %44 = vector.shape_cast %43 : vector<1x2x256xbf16> to vector<2x256xbf16>
    %45 = arith.extf %44 : vector<2x256xbf16> to vector<2x256xf32>
    %46 = arith.mulf %42, %45 : vector<2x256xf32>
    %47 = arith.truncf %46 : vector<2x256xf32> to vector<2x256xbf16>
    %c0_34 = arith.constant 0 : index
    %c0_35 = arith.constant 0 : index
    %c0_36 = arith.constant 0 : index
    %48 = vector.load %arg2[%c0_34, %c0_35, %c0_36] : memref<3x256x256xbf16, #tpu.memory_space<vmem>>, vector<1x256x256xbf16>
    %49 = vector.shape_cast %48 : vector<1x256x256xbf16> to vector<256x256xbf16>
    %cst_37 = arith.constant dense<0.000000e+00> : vector<2x256xf32>
    %50 = tpu.matmul %47, %49, %cst_37 {dimension_numbers = #tpu.dot_dimension_numbers<[1], [0], [0], [1], [0, 0, 1, 1], [], []>} : vector<2x256xbf16>, vector<256x256xbf16>, vector<2x256xf32> -> vector<2x256xf32>
    %51 = arith.addf %31, %50 : vector<2x256xf32>
    %c0_38 = arith.constant 0 : index
    %c0_39 = arith.constant 0 : index
    %52 = vector.load %arg3[%c0_38, %c0_39] : memref<2x256xf32, #tpu.memory_space<vmem>>, vector<2x256xf32>
    tpu.vector_store %arg3[%c0_38, %c0_39], %51 {strides = array<i32>} : memref<2x256xf32, #tpu.memory_space<vmem>>, vector<2x256xf32>,
    return
  }
  func.func @transform_0(%arg0: i32) -> (i32, i32) {
    %c0_i32 = arith.constant 0 : i32
    %c0_i32_0 = arith.constant 0 : i32
    return %arg0, %c0_i32 : i32, i32
  }
  func.func @transform_1(%arg0: i32) -> (i32, i32, i32) {
    %c0_i32 = arith.constant 0 : i32
    %c0_i32_0 = arith.constant 0 : i32
    %c0_i32_1 = arith.constant 0 : i32
    %c0_i32_2 = arith.constant 0 : i32
    return %c0_i32, %c0_i32_0, %c0_i32_1 : i32, i32, i32
  }
  func.func @transform_2(%arg0: i32) -> (i32, i32) {
    %c0_i32 = arith.constant 0 : i32
    %c0_i32_0 = arith.constant 0 : i32
    return %arg0, %c0_i32 : i32, i32
  }
}

</mosaic_0001>

<bundles_post_ra>
// kernel: tpu_custom_call.1
= control target key start
LH: loop header
LB: loop body
LE: loop exit
PB: predicated region body
PF: predicated region fallthrough
CT: control target
= control target key end

     0   :  { %7 = vsyncpa [#allocation4], 0  ;;  %s2169_s0 = inlined_call_operand.hbm [shape: bf16[2,256], index: 0, kind: input, shape index: {}]   ;;  %s2170_s1 = inlined_call_operand.hbm [shape: bf16[3,256,256], index: 1, kind: input, shape index: {}]   ;;  %s2171_s2 = inlined_call_operand.hbm [shape: f32[2,256], index: 2, kind: output, shape index: {}]  }
   0x1   :  { %8 = vsyncpa [#allocation7], 0 }
   0x2   :  { %9 = vsyncpa [#allocation5], 0  ;;  %s1795_s9 = smov [#allocation3]   ;;  %s1796_s11 = smov [#allocation6]  }
   0x3   :  { %s16_s10 = sshll.u32 %s1795_s9, 4  ;;  %s25_s12 = sshll.u32 %s1796_s11, 4  ;;  %s17_s10 = int_to_ptr.vmem [resolvable:$true] %s16_s10  ;;  %s1818_s12 = int_to_ptr.vmem [resolvable:$true] %s25_s12 }
   0x4   :  { %s1723_s15 = scalar_lea.hbm %s2169_s0, 32 }
   0x5   :  { %p1724_p0 = scmp.ne.s32.totalorder %s2169_s0, %s1723_s15  ;;  %p1727_p1 = scmp.lt.u32.totalorder %s1723_s15, %s2169_s0 }
   0x7   :  { %p1729_p2 = pnand %p1727_p1, %p1724_p0 }
   0x9   :  { %1732 = shalt.err (!%p1729_p2)
}
   0xa   :  { %s1733_s20 = scalar_lea.vmem %s17_s10, 32  ;;  %p1738_p4 = scmp.lt.s32.totalorder %s17_s10, %s17_s10 }
   0xb   :  { %p1734_p3 = scmp.ne.s32.totalorder %s17_s10, %s1733_s20  ;;  %p1739_p5 = scmp.lt.s32.totalorder %s1733_s20, %s1733_s20 }
   0xd   :  { %p1740_p6 = por %p1739_p5, %p1738_p4 }
   0xf   :  { %p1741_p7 = pnand %p1740_p6, %p1734_p3 }
  0x11   :  { %1744 = shalt.err (!%p1741_p7)
}
  0x12   :  { %19 = dma.hbm_to_vmem [thread:$0]  %s2169_s0, 32, %s17_s10, [#allocation4]  }
  0x13   :  { %s1745_s25 = scalar_lea.hbm %s2170_s1, 12288 }
  0x14   :  { %p1746_p8 = scmp.ne.s32.totalorder %s2170_s1, %s1745_s25  ;;  %p1749_p9 = scmp.lt.u32.totalorder %s1745_s25, %s2170_s1 }
  0x16   :  { %p1751_p10 = pnand %p1749_p9, %p1746_p8 }
  0x18   :  { %1754 = shalt.err (!%p1751_p10)
}
  0x19   :  { %s1755_s30 = scalar_lea.vmem %s1818_s12, 12288  ;;  %p1760_p12 = scmp.lt.s32.totalorder %s1818_s12, %s1818_s12 }
  0x1a   :  { %p1756_p11 = scmp.ne.s32.totalorder %s1818_s12, %s1755_s30  ;;  %p1761_p13 = scmp.lt.s32.totalorder %s1755_s30, %s1755_s30 }
  0x1c   :  { %p1762_p0 = por %p1761_p13, %p1760_p12 }
  0x1e   :  { %p1763_p1 = pnand %p1762_p0, %p1756_p11 }
  0x20   :  { %1766 = shalt.err (!%p1763_p1)
}
  0x21   :  { %s1797_s0 = smov 128   ;;  %s1798_s3 = smov 8  }
  0x22   :  { %31 = dma.hbm_to_vmem [thread:$0]  %s2170_s1, 12288, %s1818_s12, [#allocation7], %s1797_s0, %s1797_s0, %s1798_s3  }
  0x23   :  { %1789 = dma.done.wait [#allocation4], 32  }
  0x24   :  { %1790 = vsyncadd [#allocation4], 4294967264 }
  0x25   :  { %1791 = dma.done.wait [#allocation7], 12288  }
  0x26   :  { %1792 = vsyncadd [#allocation7], 4294955008  ;;  %v1849_v0 = vld [vmem:[#allocation6 + $0x4] ss:$8 sps:$4 sm:$0xff]   ;;  %v1851_v1 = vld [vmem:[#allocation6] ss:$8 sps:$4 sm:$0xff]   ;;  %v83_v7 = vlaneseq }
  0x27   :  { %256 = vmatprep.subr.bf16.mxu1 %v1849_v0  ;;  %v1854_v2 = vld [vmem:[#allocation6 + $0x14] ss:$8 sps:$4 sm:$0xff]   ;;  %v1858_v3 = vld [vmem:[#allocation6 + $0x10] ss:$8 sps:$4 sm:$0xff]   ;;  %v1860_v4 = vld [vmem:[#allocation6 + $0x24] ss:$8 sps:$4 sm:$0xff]  }
  0x28   :  { %257 = vmatpush1.bf16.xpose.msra.mxu1 %v1851_v1  ;;  %v1799_v5 = vmov 1966171168   ;;  %v1864_v8 = vld [vmem:[#allocation6 + $0x20] ss:$8 sps:$4 sm:$0xff]   ;;  %v1866_v9 = vld [vmem:[#allocation6 + $0x34] ss:$8 sps:$4 sm:$0xff]  }
  0x29   :  { %258 = vmatprep.subr.bf16.mxu1 %v1854_v2  ;;  %v81_v6 = vunpack.c.l.s4 %v1799_v5  ;;  %v1868_v11 = vshrl.u32 %v83_v7, 7  ;;  %v1875_v13 = vld.sshfl [vmem:[#allocation3] sm:$0x11 pattern:$0x75316420]  ;;  %s1802_s1 = smov [#allocation8]  }
  0x2a   :  { %v1877_v14 = vld [vmem:[#allocation6 + $0x30] ss:$8 sps:$4 sm:$0xff]   ;;  %v79_v15 = vcombine.high %v1875_v13, %v1875_v13  ;;  %v1881_v16 = vld [vmem:[#allocation6 + $0x104] ss:$8 sps:$4 sm:$0xff]   ;;  %v1886_v19 = vld [vmem:[#allocation6 + $0x100] ss:$8 sps:$4 sm:$0xff]  }
  0x2b   :  { %v82_v10 = vunpack.c.0.s8 %v81_v6  ;;  %2176 = vst [vmem:[#allocation12_spill] sm:$0xff] %v1868_v11  ;;  %v1883_v17 = vld [vmem:[#allocation6 + $0x44] ss:$8 sps:$4 sm:$0xff]   ;;  %v1888_v20 = vld [vmem:[#allocation6 + $0x114] ss:$8 sps:$4 sm:$0xff]   ;;  %819 = vmatprep.subr.bf16.mxu0 %v1881_v16  ;;  %s1387_s6 = sshll.u32 %s1802_s1, 4  ;;  %s1388_s6 = int_to_ptr.vmem [resolvable:$true] %s1387_s6 }
  0x2c   :  { %820 = vmatpush1.bf16.msra.mxu0 %v1886_v19  ;;  %v1895_v21 = vld [vmem:[#allocation6 + $0x110] ss:$8 sps:$4 sm:$0xff]   ;;  %v1897_v22 = vld [vmem:[#allocation6 + $0x124] ss:$8 sps:$4 sm:$0xff]   ;;  %v1899_v23 = vld [vmem:[#allocation6 + $0x40] ss:$8 sps:$4 sm:$0xff]   ;;  %p1772_p3 = scmp.lt.s32.totalorder %s1388_s6, %s1388_s6 }
  0x2d   :  { %v1873_v12 = vsub.s32 %v82_v10, %v1868_v11  ;;  %821 = vmatprep.subr.bf16.mxu0 %v1888_v20  ;;  %v1901_v24 = vld [vmem:[#allocation6 + $0x54] ss:$8 sps:$4 sm:$0xff]   ;;  %v1903_v25 = vld [vmem:[#allocation6 + $0x120] ss:$8 sps:$4 sm:$0xff]   ;;  %v1911_v27 = vld [vmem:[#allocation6 + $0x130] ss:$8 sps:$4 sm:$0xff]  }
  0x2e   :  { %v1906_v26 = vld [vmem:[#allocation6 + $0x134] ss:$8 sps:$4 sm:$0xff]   ;;  %v1913_v28 = vld [vmem:[#allocation6 + $0x144] ss:$8 sps:$4 sm:$0xff]   ;;  %v1917_v29 = vld [vmem:[#allocation6 + $0x50] ss:$8 sps:$4 sm:$0xff]  }
  0x2f   :  { %v93_v18 = vrot.slane %v79_v15, %v1873_v12  ;;  %v1919_v30 = vld [vmem:[#allocation6 + $0x64] ss:$8 sps:$4 sm:$0xff]   ;;  %v1921_v31 = vld [vmem:[#allocation6 + $0x140] ss:$8 sps:$4 sm:$0xff]   ;;  %v1924_v32 = vld [vmem:[#allocation6 + $0x154] ss:$8 sps:$4 sm:$0xff]  }
  0x30   :  { %259 = vmatpush1.bf16.xpose.msra.mxu1 %v1858_v3  ;;  %822 = vmatpush1.bf16.msra.mxu0 %v1895_v21  ;;  %v1929_v33 = vld [vmem:[#allocation6 + $0x150] ss:$8 sps:$4 sm:$0xff]   ;;  %v1931_v34 = vld [vmem:[#allocation6 + $0x164] ss:$8 sps:$4 sm:$0xff]   ;;  %v1935_v35 = vld [vmem:[#allocation6 + $0x60] ss:$8 sps:$4 sm:$0xff]  }
  0x31   :  { %260 = vmatprep.subr.bf16.mxu1 %v1860_v4  ;;  %288 = vmatprep.mubr.bf16.mxu1 %v93_v18  ;;  %v1939_v36 = vld [vmem:[#allocation6 + $0x74] ss:$8 sps:$4 sm:$0xff]   ;;  %v1941_v37 = vld [vmem:[#allocation6 + $0x160] ss:$8 sps:$4 sm:$0xff]   ;;  %v1948_v39 = vld [vmem:[#allocation6 + $0x170] ss:$8 sps:$4 sm:$0xff]  }
  0x32   :  { %851 = vmatprep.mubr.bf16.mxu0 %v93_v18  ;;  %823 = vmatprep.subr.bf16.mxu0 %v1897_v22  ;;  %v1945_v38 = vld [vmem:[#allocation6 + $0x174] ss:$8 sps:$4 sm:$0xff]   ;;  %v1952_v40 = vld [vmem:[#allocation6 + $0x70] ss:$8 sps:$4 sm:$0xff]   ;;  %v1954_v41 = vld [vmem:[#allocation6 + $0x84] ss:$8 sps:$4 sm:$0xff]  }
  0x33   :  { %v1957_v42 = vld [vmem:[#allocation6 + $0x184] ss:$8 sps:$4 sm:$0xff]   ;;  %v1960_v43 = vld [vmem:[#allocation6 + $0x180] ss:$8 sps:$4 sm:$0xff]   ;;  %v1966_v45 = vld [vmem:[#allocation6 + $0x94] ss:$8 sps:$4 sm:$0xff]  }
  0x34   :  { %824 = vmatpush1.bf16.msra.mxu0 %v1903_v25  ;;  %v1964_v44 = vld [vmem:[#allocation6 + $0x80] ss:$8 sps:$4 sm:$0xff]   ;;  %v1969_v46 = vld [vmem:[#allocation6 + $0x194] ss:$8 sps:$4 sm:$0xff]   ;;  %v1972_v47 = vld [vmem:[#allocation6 + $0x190] ss:$8 sps:$4 sm:$0xff]  }
  0x35   :  { %825 = vmatprep.subr.bf16.mxu0 %v1906_v26  ;;  %v1976_v48 = vld [vmem:[#allocation6 + $0x90] ss:$8 sps:$4 sm:$0xff]   ;;  %v1978_v49 = vld [vmem:[#allocation6 + $0xa4] ss:$8 sps:$4 sm:$0xff]   ;;  %v1984_v51 = vld [vmem:[#allocation6 + $0x1a0] ss:$8 sps:$4 sm:$0xff]  }
  0x36   :  { %v1981_v50 = vld [vmem:[#allocation6 + $0x1a4] ss:$8 sps:$4 sm:$0xff]   ;;  %v1988_v52 = vld [vmem:[#allocation6 + $0xa0] ss:$8 sps:$4 sm:$0xff]   ;;  %v1990_v53 = vld [vmem:[#allocation6 + $0xb4] ss:$8 sps:$4 sm:$0xff]  }
  0x37   :  { %v1993_v54 = vld [vmem:[#allocation6 + $0x1b4] ss:$8 sps:$4 sm:$0xff]   ;;  %v1996_v55 = vld [vmem:[#allocation6 + $0x1b0] ss:$8 sps:$4 sm:$0xff]   ;;  %v2002_v57 = vld [vmem:[#allocation6 + $0xc4] ss:$8 sps:$4 sm:$0xff]  }
  0x38   :  { %261 = vmatpush1.bf16.xpose.msra.mxu1 %v1864_v8  ;;  %826 = vmatpush1.bf16.msra.mxu0 %v1911_v27  ;;  %v2000_v56 = vld [vmem:[#allocation6 + $0xb0] ss:$8 sps:$4 sm:$0xff]   ;;  %v2005_v58 = vld [vmem:[#allocation6 + $0x1c4] ss:$8 sps:$4 sm:$0xff]   ;;  %v2008_v59 = vld [vmem:[#allocation6 + $0x1c0] ss:$8 sps:$4 sm:$0xff]  }
  0x39   :  { %262 = vmatprep.subr.bf16.mxu1 %v1866_v9  ;;  %827 = vmatprep.subr.bf16.mxu0 %v1913_v28  ;;  %v2012_v60 = vld [vmem:[#allocation6 + $0xc0] ss:$8 sps:$4 sm:$0xff]   ;;  %v2014_v61 = vld [vmem:[#allocation6 + $0xd4] ss:$8 sps:$4 sm:$0xff]   ;;  %v2020_v63 = vld [vmem:[#allocation6 + $0x1d0] ss:$8 sps:$4 sm:$0xff]  }
  0x3a   :  { %v2017_v62 = vld [vmem:[#allocation6 + $0x1d4] ss:$8 sps:$4 sm:$0xff]   ;;  %2178 = vst [vmem:[#allocation14_spill] sm:$0xff] %v2020_v63  ;;  %v2024_v5 = vld [vmem:[#allocation6 + $0xd0] ss:$8 sps:$4 sm:$0xff]   ;;  %s1767_s7 = scalar_lea.vmem %s1388_s6, 64 }
  0x3b   :  { %2177 = vst [vmem:[#allocation13_spill] sm:$0xff] %v2017_v62  ;;  %v2026_v6 = vld [vmem:[#allocation6 + $0xe4] ss:$8 sps:$4 sm:$0xff]   ;;  %v2032_v10 = vld [vmem:[#allocation6 + $0x1e0] ss:$8 sps:$4 sm:$0xff]   ;;  %p1768_p2 = scmp.ne.s32.totalorder %s1388_s6, %s1767_s7  ;;  %p1773_p4 = scmp.lt.s32.totalorder %s1767_s7, %s1767_s7 }
  0x3c   :  { %828 = vmatpush1.bf16.msra.mxu0 %v1921_v31  ;;  %v2029_v7 = vld [vmem:[#allocation6 + $0x1e4] ss:$8 sps:$4 sm:$0xff]   ;;  %2179 = vst [vmem:[#allocation15_spill] sm:$0xff] %v2032_v10  ;;  %v2036_v15 = vld [vmem:[#allocation6 + $0xe0] ss:$8 sps:$4 sm:$0xff]  }
  0x3d   :  { %829 = vmatprep.subr.bf16.mxu0 %v1924_v32  ;;  %v2038_v18 = vld [vmem:[#allocation6 + $0xf4] ss:$8 sps:$4 sm:$0xff]   ;;  %p1774_p5 = por %p1773_p4, %p1772_p3 }
  0x3e   :  { %v2041_v11 = vld [vmem:[#allocation6 + $0x1f4] ss:$8 sps:$4 sm:$0xff]  }
  0x3f   :  { %p1775_p6 = pnand %p1774_p5, %p1768_p2 }
  0x40   :  { %263 = vmatpush1.bf16.xpose.msra.mxu1 %v1877_v14  ;;  %830 = vmatpush1.bf16.msra.mxu0 %v1929_v33 }
  0x41   :  { %264 = vmatprep.subr.bf16.mxu1 %v1883_v17  ;;  %831 = vmatprep.subr.bf16.mxu0 %v1931_v34 }
  0x44   :  { %832 = vmatpush1.bf16.msra.mxu0 %v1941_v37 }
  0x45   :  { %833 = vmatprep.subr.bf16.mxu0 %v1945_v38 }
  0x48   :  { %265 = vmatpush1.bf16.xpose.msra.mxu1 %v1899_v23  ;;  %834 = vmatpush1.bf16.msra.mxu0 %v1948_v39 }
  0x49   :  { %266 = vmatprep.subr.bf16.mxu1 %v1901_v24  ;;  %835 = vmatprep.subr.bf16.mxu0 %v1957_v42 }
  0x4c   :  { %836 = vmatpush1.bf16.msra.mxu0 %v1960_v43 }
  0x4d   :  { %837 = vmatprep.subr.bf16.mxu0 %v1969_v46 }
  0x50   :  { %267 = vmatpush1.bf16.xpose.msra.mxu1 %v1917_v29  ;;  %838 = vmatpush1.bf16.msra.mxu0 %v1972_v47 }
  0x51   :  { %268 = vmatprep.subr.bf16.mxu1 %v1919_v30  ;;  %839 = vmatprep.subr.bf16.mxu0 %v1981_v50 }
  0x54   :  { %840 = vmatpush1.bf16.msra.mxu0 %v1984_v51 }
  0x55   :  { %841 = vmatprep.subr.bf16.mxu0 %v1993_v54 }
  0x58   :  { %269 = vmatpush1.bf16.xpose.msra.mxu1 %v1935_v35  ;;  %842 = vmatpush1.bf16.msra.mxu0 %v1996_v55 }
  0x59   :  { %270 = vmatprep.subr.bf16.mxu1 %v1939_v36  ;;  %843 = vmatprep.subr.bf16.mxu0 %v2005_v58 }
  0x5c   :  { %844 = vmatpush1.bf16.msra.mxu0 %v2008_v59 }
  0x5d   :  { %845 = vmatprep.subr.bf16.mxu0 %v2017_v62  ;;  %v2048_v62 = vld [vmem:[#allocation6 + $0xf0] ss:$8 sps:$4 sm:$0xff]  }
  0x60   :  { %271 = vmatpush1.bf16.xpose.msra.mxu1 %v1952_v40  ;;  %846 = vmatpush1.bf16.msra.mxu0 %v2020_v63  ;;  %v2044_v63 = vld [vmem:[#allocation6 + $0x1f0] ss:$8 sps:$4 sm:$0xff]  }
  0x61   :  { %272 = vmatprep.subr.bf16.mxu1 %v1954_v41  ;;  %847 = vmatprep.subr.bf16.mxu0 %v2029_v7 }
  0x64   :  { %848 = vmatpush1.bf16.msra.mxu0 %v2032_v10  ;;  %v86_v10 = vrot.slane %v1875_v13, %v1873_v12  ;;  %v2180_v13 = vld [vmem:[#allocation13_spill] sm:$0xff] }
  0x65   :  { %849 = vmatprep.subr.bf16.mxu0 %v2041_v11 }
  0x68   :  { %273 = vmatpush1.bf16.xpose.msra.mxu1 %v1964_v44  ;;  %850 = vmatpush1.bf16.msra.mxu0 %v2044_v63 }
  0x69   :  { %274 = vmatprep.subr.bf16.mxu1 %v1966_v45  ;;  %1127 = vmatprep.subr.bf16.mxu0 %v1849_v0 }
  0x6b   :  { %852 = vmatmul.mubr.bf16.vlgmr.msra.gmra.mrb[0].mxu0 %v86_v10 }
  0x6c   :  { %1128 = vmatpush1.bf16.msra.mxu0 %v1851_v1 }
  0x6d   :  { %1129 = vmatprep.subr.bf16.mxu0 %v1854_v2 }
  0x70   :  { %275 = vmatpush1.bf16.xpose.msra.mxu1 %v1976_v48  ;;  %1130 = vmatpush1.bf16.msra.mxu0 %v1858_v3 }
  0x71   :  { %276 = vmatprep.subr.bf16.mxu1 %v1978_v49  ;;  %1131 = vmatprep.subr.bf16.mxu0 %v1860_v4 }
  0x74   :  { %1132 = vmatpush1.bf16.msra.mxu0 %v1864_v8 }
  0x75   :  { %1133 = vmatprep.subr.bf16.mxu0 %v1866_v9 }
  0x78   :  { %277 = vmatpush1.bf16.xpose.msra.mxu1 %v1988_v52  ;;  %1134 = vmatpush1.bf16.msra.mxu0 %v1877_v14 }
  0x79   :  { %278 = vmatprep.subr.bf16.mxu1 %v1990_v53  ;;  %1135 = vmatprep.subr.bf16.mxu0 %v1883_v17 }
  0x7c   :  { %1136 = vmatpush1.bf16.msra.mxu0 %v1899_v23 }
  0x7d   :  { %1137 = vmatprep.subr.bf16.mxu0 %v1901_v24 }
  0x80   :  { %279 = vmatpush1.bf16.xpose.msra.mxu1 %v2000_v56  ;;  %1138 = vmatpush1.bf16.msra.mxu0 %v1917_v29 }
  0x81   :  { %280 = vmatprep.subr.bf16.mxu1 %v2002_v57  ;;  %1139 = vmatprep.subr.bf16.mxu0 %v1919_v30 }
  0x84   :  { %1140 = vmatpush1.bf16.msra.mxu0 %v1935_v35 }
  0x85   :  { %1141 = vmatprep.subr.bf16.mxu0 %v1939_v36 }
  0x88   :  { %281 = vmatpush1.bf16.xpose.msra.mxu1 %v2012_v60  ;;  %1142 = vmatpush1.bf16.msra.mxu0 %v1952_v40 }
  0x89   :  { %282 = vmatprep.subr.bf16.mxu1 %v2014_v61  ;;  %1143 = vmatprep.subr.bf16.mxu0 %v1954_v41 }
  0x8c   :  { %1144 = vmatpush1.bf16.msra.mxu0 %v1964_v44 }
  0x8d   :  { %1145 = vmatprep.subr.bf16.mxu0 %v1966_v45 }
  0x90   :  { %283 = vmatpush1.bf16.xpose.msra.mxu1 %v2024_v5  ;;  %1146 = vmatpush1.bf16.msra.mxu0 %v1976_v48 }
  0x91   :  { %284 = vmatprep.subr.bf16.mxu1 %v2026_v6  ;;  %1147 = vmatprep.subr.bf16.mxu0 %v1978_v49 }
  0x94   :  { %1148 = vmatpush1.bf16.msra.mxu0 %v1988_v52 }
  0x95   :  { %1149 = vmatprep.subr.bf16.mxu0 %v1990_v53 }
  0x98   :  { %285 = vmatpush1.bf16.xpose.msra.mxu1 %v2036_v15  ;;  %1150 = vmatpush1.bf16.msra.mxu0 %v2000_v56 }
  0x99   :  { %286 = vmatprep.subr.bf16.mxu1 %v2038_v18  ;;  %1151 = vmatprep.subr.bf16.mxu0 %v2002_v57 }
  0x9c   :  { %1152 = vmatpush1.bf16.msra.mxu0 %v2012_v60 }
  0x9d   :  { %1153 = vmatprep.subr.bf16.mxu0 %v2014_v61 }
  0xa0   :  { %287 = vmatpush1.bf16.xpose.msra.mxu1 %v2048_v62  ;;  %1154 = vmatpush1.bf16.msra.mxu0 %v2024_v5 }
  0xa1   :  { %521 = vmatprep.subr.bf16.mxu1 %v1881_v16  ;;  %1155 = vmatprep.subr.bf16.mxu0 %v2026_v6  ;;  %v2181_v16 = vld [vmem:[#allocation14_spill] sm:$0xff] }
  0xa4   :  { %1156 = vmatpush1.bf16.msra.mxu0 %v2036_v15 }
  0xa5   :  { %1157 = vmatprep.subr.bf16.mxu0 %v2038_v18 }
  0xa7   :  { %289 = vmatmul.mubr.bf16.vlgmr.msra.gmra.mrb[0].mxu1 %v86_v10  ;;  %v1681_v10 = vld [vmem:[#allocation6 + $0x220] ss:$8 sps:$4 sm:$0xff]  }
  0xa8   :  { %522 = vmatpush1.bf16.xpose.msra.mxu1 %v1886_v19  ;;  %1158 = vmatpush1.bf16.msra.mxu0 %v2048_v62  ;;  %v2182_v19 = vld [vmem:[#allocation15_spill] sm:$0xff] }
  0xa9   :  { %523 = vmatprep.subr.bf16.mxu1 %v1888_v20 }
  0xb0   :  { %524 = vmatpush1.bf16.xpose.msra.mxu1 %v1895_v21 }
  0xb1   :  { %525 = vmatprep.subr.bf16.mxu1 %v1897_v22 }
  0xb8   :  { %526 = vmatpush1.bf16.xpose.msra.mxu1 %v1903_v25 }
  0xb9   :  { %527 = vmatprep.subr.bf16.mxu1 %v1906_v26 }
  0xc0   :  { %528 = vmatpush1.bf16.xpose.msra.mxu1 %v1911_v27 }
  0xc1   :  { %529 = vmatprep.subr.bf16.mxu1 %v1913_v28  ;;  %v1800_v28 = vmov 0.0  }
  0xc8   :  { %530 = vmatpush1.bf16.xpose.msra.mxu1 %v1921_v31 }
  0xc9   :  { %531 = vmatprep.subr.bf16.mxu1 %v1924_v32 }
  0xd0   :  { %532 = vmatpush1.bf16.xpose.msra.mxu1 %v1929_v33 }
  0xd1   :  { %533 = vmatprep.subr.bf16.mxu1 %v1931_v34 }
  0xd8   :  { %534 = vmatpush1.bf16.xpose.msra.mxu1 %v1941_v37 }
  0xd9   :  { %535 = vmatprep.subr.bf16.mxu1 %v1945_v38 }
  0xe0   :  { %536 = vmatpush1.bf16.xpose.msra.mxu1 %v1948_v39 }
  0xe1   :  { %537 = vmatprep.subr.bf16.mxu1 %v1957_v42  ;;  %v2183_v42 = vld [vmem:[#allocation12_spill] sm:$0xff] }
  0xe8   :  { %538 = vmatpush1.bf16.xpose.msra.mxu1 %v1960_v43 }
  0xe9   :  { %539 = vmatprep.subr.bf16.mxu1 %v1969_v46 }
  0xf0   :  { %540 = vmatpush1.bf16.xpose.msra.mxu1 %v1972_v47 }
  0xf1   :  { %541 = vmatprep.subr.bf16.mxu1 %v1981_v50  ;;  %v1677_v50 = vld [vmem:[#allocation6 + $0x204] ss:$8 sps:$4 sm:$0xff]  }
  0xf2   :  { %1328 = vmatprep.subr.bf16.mxu0 %v1677_v50 }
  0xf8   :  { %542 = vmatpush1.bf16.xpose.msra.mxu1 %v1984_v51 }
  0xf9   :  { %543 = vmatprep.subr.bf16.mxu1 %v1993_v54 }
 0x100   :  { %544 = vmatpush1.bf16.xpose.msra.mxu1 %v1996_v55 }
 0x101   :  { %545 = vmatprep.subr.bf16.mxu1 %v2005_v58 }
 0x108   :  { %546 = vmatpush1.bf16.xpose.msra.mxu1 %v2008_v59 }
 0x109   :  { %547 = vmatprep.subr.bf16.mxu1 %v2180_v13  ;;  %v1689_v13 = vld [vmem:[#allocation6 + $0x244] ss:$8 sps:$4 sm:$0xff]  }
 0x110   :  { %548 = vmatpush1.bf16.xpose.msra.mxu1 %v2181_v16  ;;  %v1687_v16 = vld [vmem:[#allocation6 + $0x240] ss:$8 sps:$4 sm:$0xff]  }
 0x111   :  { %549 = vmatprep.subr.bf16.mxu1 %v2029_v7  ;;  %v1683_v7 = vld [vmem:[#allocation6 + $0x224] ss:$8 sps:$4 sm:$0xff]  }
 0x118   :  { %550 = vmatpush1.bf16.xpose.msra.mxu1 %v2182_v19  ;;  %v1692_v19 = vld [vmem:[#allocation6 + $0x254] ss:$8 sps:$4 sm:$0xff]  }
 0x119   :  { %551 = vmatprep.subr.bf16.mxu1 %v2041_v11 }
 0x120   :  { %552 = vmatpush1.bf16.xpose.msra.mxu1 %v2044_v63  ;;  %v1680_v63 = vld [vmem:[#allocation6 + $0x214] ss:$8 sps:$4 sm:$0xff]  }
 0x121   :  { %1069 = vmatprep.subr.bf16.mxu1 %v1849_v0 }
 0x13e   :  { %v853_v0 = vpop.f32.mrb[0].mxu0 }
 0x17a   :  { %v290_v20 = vpop.f32.mrb[0].mxu1 }
 0x17b   :  { %v297_v21 = vmax.f32 %v290_v20, 0.0  ;;  %v292_v22 = vpop.f32.mrb[1].mxu1  ;;  %v1690_v20 = vld [vmem:[#allocation6 + $0x250] ss:$8 sps:$4 sm:$0xff]  }
 0x17c   :  { %v298_v25 = vmax.f32 %v292_v22, 0.0  ;;  %v294_v26 = vpop.f32.mrb[2].mxu1  ;;  %v1693_v22 = vld [vmem:[#allocation6 + $0x260] ss:$8 sps:$4 sm:$0xff]  }
 0x17d   :  { %vm299_vm0 = vcmp.gt.f32.partialorder %v297_v21, 0.0  ;;  %v295_v27 = vpop.f32.mrb[3].mxu1  ;;  %v326_v33 = vpack.c.bf16 %v297_v21, %v297_v21  ;;  %v1695_v21 = vld [vmem:[#allocation6 + $0x264] ss:$8 sps:$4 sm:$0xff]   ;;  %v1696_v26 = vld [vmem:[#allocation6 + $0x270] ss:$8 sps:$4 sm:$0xff]  }
 0x17e   :  { %v1430_v31 = vsel %vm299_vm0, 1.0, %v1800_v28  ;;  %vm300_vm1 = vcmp.gt.f32.partialorder %v298_v25, 0.0  ;;  %v327_v32 = vpack.c.bf16 %v298_v25, %v298_v25  ;;  %v1698_v25 = vld [vmem:[#allocation6 + $0x274] ss:$8 sps:$4 sm:$0xff]   ;;  %v1701_v27 = vld [vmem:[#allocation6 + $0x284] ss:$8 sps:$4 sm:$0xff]  }
 0x17f   :  { %v1431_v34 = vsel %vm300_vm1, 1.0, %v1800_v28 }
 0x180   :  { %v1432_v37 = vpack.c.bf16 %v1431_v34, %v1430_v31  ;;  %553 = vmatprep.mubr.bf16.mxu1 %v327_v32  ;;  %v1704_v31 = vld [vmem:[#allocation6 + $0x294] ss:$8 sps:$4 sm:$0xff]   ;;  %v1702_v32 = vld [vmem:[#allocation6 + $0x290] ss:$8 sps:$4 sm:$0xff]   ;;  %v1705_v34 = vld [vmem:[#allocation6 + $0x2a0] ss:$8 sps:$4 sm:$0xff]  }
 0x181   :  { %554 = vmatmul.mubr.bf16.vlgmr.msra.gmra.mrb[4].mxu1 %v326_v33  ;;  %v1707_v33 = vld [vmem:[#allocation6 + $0x2a4] ss:$8 sps:$4 sm:$0xff]  }
 0x182   :  { %v316_v11 = vrot.slane %v1432_v37, %v1873_v12  ;;  %1070 = vmatpush1.bf16.msra.mxu1 %v1851_v1  ;;  %v855_v1 = vpop.f32.mrb[1].mxu0  ;;  %v1710_v37 = vld [vmem:[#allocation6 + $0x2b4] ss:$8 sps:$4 sm:$0xff]  }
 0x183   :  { %1071 = vmatprep.subr.bf16.mxu1 %v1854_v2  ;;  %v857_v2 = vpop.f32.mrb[2].mxu0 }
 0x184   :  { %1433 = vst.sshfl [vmem:[#allocation2] sm:$0x5 pattern:$0x73625140] %v316_v11  ;;  %v1708_v11 = vld [vmem:[#allocation6 + $0x2b0] ss:$8 sps:$4 sm:$0xff]  }
 0x185   :  { %v1716_v2 = vld [vmem:[#allocation6 + $0x2d4] ss:$8 sps:$4 sm:$0xff]  }
 0x186   :  { %1072 = vmatpush1.bf16.msra.mxu1 %v1858_v3  ;;  %v858_v3 = vpop.f32.mrb[3].mxu0 }
 0x187   :  { %1073 = vmatprep.subr.bf16.mxu1 %v1860_v4  ;;  %v1714_v3 = vld [vmem:[#allocation6 + $0x2d0] ss:$8 sps:$4 sm:$0xff]  }
 0x18a   :  { %1074 = vmatpush1.bf16.msra.mxu1 %v1864_v8 }
 0x18b   :  { %1075 = vmatprep.subr.bf16.mxu1 %v1866_v9  ;;  %v1110_v51 = vld [vmem:[#allocation2] sm:$0x3] }
 0x18e   :  { %1076 = vmatpush1.bf16.msra.mxu1 %v1877_v14 }
 0x18f   :  { %1077 = vmatprep.subr.bf16.mxu1 %v1883_v17 }
 0x192   :  { %1078 = vmatpush1.bf16.msra.mxu1 %v1899_v23 }
 0x193   :  { %1079 = vmatprep.subr.bf16.mxu1 %v1901_v24 }
 0x196   :  { %1080 = vmatpush1.bf16.msra.mxu1 %v1917_v29 }
 0x197   :  { %1081 = vmatprep.subr.bf16.mxu1 %v1919_v30 }
 0x19a   :  { %1082 = vmatpush1.bf16.msra.mxu1 %v1935_v35 }
 0x19b   :  { %1083 = vmatprep.subr.bf16.mxu1 %v1939_v36  ;;  %v1801_v36 = vmov 1983009808  }
 0x19c   :  { %v864_v38 = vunpack.c.l.s4 %v1801_v36 }
 0x19e   :  { %1084 = vmatpush1.bf16.msra.mxu1 %v1952_v40  ;;  %v865_v39 = vunpack.c.0.s8 %v864_v38 }
 0x19f   :  { %1085 = vmatprep.subr.bf16.mxu1 %v1954_v41 }
 0x1a0   :  { %v868_v43 = vsub.s32 %v865_v39, %v2183_v42 }
 0x1a2   :  { %1086 = vmatpush1.bf16.msra.mxu1 %v1964_v44 }
 0x1a3   :  { %1087 = vmatprep.subr.bf16.mxu1 %v1966_v45 }
 0x1a6   :  { %1088 = vmatpush1.bf16.msra.mxu1 %v1976_v48 }
 0x1a7   :  { %1089 = vmatprep.subr.bf16.mxu1 %v1978_v49 }
 0x1aa   :  { %1090 = vmatpush1.bf16.msra.mxu1 %v1988_v52 }
 0x1ab   :  { %1091 = vmatprep.subr.bf16.mxu1 %v1990_v53 }
 0x1ae   :  { %1092 = vmatpush1.bf16.msra.mxu1 %v2000_v56 }
 0x1af   :  { %1093 = vmatprep.subr.bf16.mxu1 %v2002_v57 }
 0x1b2   :  { %1094 = vmatpush1.bf16.msra.mxu1 %v2012_v60 }
 0x1b3   :  { %1095 = vmatprep.subr.bf16.mxu1 %v2014_v61  ;;  %v1675_v61 = vld [vmem:[#allocation6 + $0x200] ss:$8 sps:$4 sm:$0xff]  }
 0x1b6   :  { %1096 = vmatpush1.bf16.msra.mxu1 %v2024_v5 }
 0x1b7   :  { %1097 = vmatprep.subr.bf16.mxu1 %v2026_v6  ;;  %v1678_v6 = vld [vmem:[#allocation6 + $0x210] ss:$8 sps:$4 sm:$0xff]  }
 0x1ba   :  { %1098 = vmatpush1.bf16.msra.mxu1 %v2036_v15  ;;  %v1686_v15 = vld [vmem:[#allocation6 + $0x234] ss:$8 sps:$4 sm:$0xff]  }
 0x1bb   :  { %1099 = vmatprep.subr.bf16.mxu1 %v2038_v18  ;;  %v1684_v18 = vld [vmem:[#allocation6 + $0x230] ss:$8 sps:$4 sm:$0xff]  }
 0x1be   :  { %1100 = vmatpush1.bf16.msra.mxu1 %v2048_v62 }
 0x254   :  { %v555_v4 = vpop.f32.mrb[4].mxu1 }
 0x255   :  { %v2150_v8 = vmax.f32 %v555_v4, 0.0  ;;  %v557_v9 = vpop.f32.mrb[5].mxu1  ;;  %v1719_v4 = vld [vmem:[#allocation6 + $0x2e4] ss:$8 sps:$4 sm:$0xff]  }
 0x256   :  { %v563_v14 = vmax.f32 %v557_v9, 0.0  ;;  %v559_v17 = vpop.f32.mrb[6].mxu1  ;;  %v1717_v9 = vld [vmem:[#allocation6 + $0x2e0] ss:$8 sps:$4 sm:$0xff]  }
 0x257   :  { %vm564_vm2 = vcmp.gt.f32.partialorder %v2150_v8, 0.0  ;;  %v560_v23 = vpop.f32.mrb[7].mxu1  ;;  %v1720_v17 = vld [vmem:[#allocation6 + $0x2f0] ss:$8 sps:$4 sm:$0xff]  }
 0x258   :  { %v1466_v24 = vsel %vm564_vm2, 1.0, %v1800_v28  ;;  %vm565_vm3 = vcmp.gt.f32.partialorder %v563_v14, 0.0  ;;  %v593_v5 = vpack.c.bf16 %v563_v14, %v563_v14  ;;  %v1722_v14 = vld [vmem:[#allocation6 + $0x2f4] ss:$8 sps:$4 sm:$0xff]   ;;  %v592_v23 = vpack.c.bf16 %v2150_v8, %v2150_v8 }
 0x259   :  { %v1467_v29 = vsel %vm565_vm3, 1.0, %v1800_v28  ;;  %v1699_v28 = vld [vmem:[#allocation6 + $0x280] ss:$8 sps:$4 sm:$0xff]  }
 0x25a   :  { %v1468_v30 = vpack.c.bf16 %v1467_v29, %v1466_v24 }
 0x25c   :  { %v581_v35 = vrot.slane %v1468_v30, %v1873_v12  ;;  %v1111_v12 = vunpack.c.l.bf16 %v1110_v51 }
 0x25e   :  { %1469 = vst.sshfl [vmem:[#allocation2 + $0x2] sm:$0x5 pattern:$0x73625140] %v581_v35  ;;  %v1119_v52 = vrot.slane %v1111_v12, %v868_v43 }
 0x260   :  { %v1120_v54 = vcombine.high %v1119_v52, %v1119_v52 }
 0x265   :  { %v860_v40 = vld [vmem:[#allocation2 + $0x2] sm:$0x3] }
 0x266   :  { %v861_v41 = vunpack.c.l.bf16 %v860_v40 }
 0x268   :  { %v869_v44 = vrot.slane %v861_v41, %v868_v43 }
 0x26a   :  { %v870_v45 = vcombine.high %v869_v44, %v869_v44  ;;  %v873_v46 = vmul.f32 %v869_v44, %v853_v0  ;;  %v1713_v0 = vld [vmem:[#allocation6 + $0x2c4] ss:$8 sps:$4 sm:$0xff]  }
 0x26c   :  { %v874_v47 = vmul.f32 %v870_v45, %v855_v1  ;;  %v875_v49 = vpack.c.bf16 %v873_v46, %v873_v46  ;;  %v1711_v1 = vld [vmem:[#allocation6 + $0x2c0] ss:$8 sps:$4 sm:$0xff]  }
 0x26e   :  { %v876_v48 = vpack.c.bf16 %v874_v47, %v874_v47 }
 0x270   :  { %1101 = vmatprep.mubr.bf16.mxu1 %v876_v48 }
 0x271   :  { %1102 = vmatmul.mubr.bf16.vlgmr.msra.gmra.mrb[8].mxu1 %v875_v49 }
 0x344   :  { %v1103_v53 = vpop.f32.mrb[8].mxu1 }
 0x345   :  { %v1123_v55 = vmul.f32 %v1119_v52, %v1103_v53  ;;  %v1105_v56 = vpop.f32.mrb[9].mxu1 }
 0x346   :  { %v1124_v57 = vmul.f32 %v1120_v54, %v1105_v56  ;;  %v1107_v58 = vpop.f32.mrb[10].mxu1 }
 0x347   :  { %v1108_v59 = vpop.f32.mrb[11].mxu1  ;;  %v1125_v62 = vpack.c.bf16 %v1123_v55, %v1123_v55 }
 0x348   :  { %v1126_v60 = vpack.c.bf16 %v1124_v57, %v1124_v57 }
 0x34a   :  { %1159 = vmatprep.mubr.bf16.mxu0 %v1126_v60 }
 0x34b   :  { %1160 = vmatmul.mubr.bf16.vlgmr.msra.gmra.mrb[4].mxu0 %v1125_v62 }
 0x34c   :  { %1329 = vmatpush1.bf16.xpose.msra.mxu0 %v1675_v61  ;;  %1360 = vmatprep.mubr.bf16.mxu0 %v593_v5 }
 0x34d   :  { %1330 = vmatprep.subr.bf16.mxu0 %v1680_v63 }
 0x354   :  { %1331 = vmatpush1.bf16.xpose.msra.mxu0 %v1678_v6 }
 0x355   :  { %1332 = vmatprep.subr.bf16.mxu0 %v1683_v7 }
 0x35c   :  { %1333 = vmatpush1.bf16.xpose.msra.mxu0 %v1681_v10 }
 0x35d   :  { %1334 = vmatprep.subr.bf16.mxu0 %v1686_v15 }
 0x364   :  { %1335 = vmatpush1.bf16.xpose.msra.mxu0 %v1684_v18 }
 0x365   :  { %1336 = vmatprep.subr.bf16.mxu0 %v1689_v13 }
 0x36c   :  { %1337 = vmatpush1.bf16.xpose.msra.mxu0 %v1687_v16 }
 0x36d   :  { %1338 = vmatprep.subr.bf16.mxu0 %v1692_v19 }
 0x374   :  { %1339 = vmatpush1.bf16.xpose.msra.mxu0 %v1690_v20 }
 0x375   :  { %1340 = vmatprep.subr.bf16.mxu0 %v1695_v21 }
 0x37c   :  { %1341 = vmatpush1.bf16.xpose.msra.mxu0 %v1693_v22 }
 0x37d   :  { %1342 = vmatprep.subr.bf16.mxu0 %v1698_v25 }
 0x384   :  { %1343 = vmatpush1.bf16.xpose.msra.mxu0 %v1696_v26 }
 0x385   :  { %1344 = vmatprep.subr.bf16.mxu0 %v1701_v27 }
 0x38c   :  { %1345 = vmatpush1.bf16.xpose.msra.mxu0 %v1699_v28 }
 0x38d   :  { %1346 = vmatprep.subr.bf16.mxu0 %v1704_v31 }
 0x394   :  { %1347 = vmatpush1.bf16.xpose.msra.mxu0 %v1702_v32 }
 0x395   :  { %1348 = vmatprep.subr.bf16.mxu0 %v1707_v33 }
 0x39c   :  { %1349 = vmatpush1.bf16.xpose.msra.mxu0 %v1705_v34 }
 0x39d   :  { %1350 = vmatprep.subr.bf16.mxu0 %v1710_v37 }
 0x3a4   :  { %1351 = vmatpush1.bf16.xpose.msra.mxu0 %v1708_v11 }
 0x3a5   :  { %1352 = vmatprep.subr.bf16.mxu0 %v1713_v0 }
 0x3ac   :  { %1353 = vmatpush1.bf16.xpose.msra.mxu0 %v1711_v1 }
 0x3ad   :  { %1354 = vmatprep.subr.bf16.mxu0 %v1716_v2 }
 0x3b4   :  { %1355 = vmatpush1.bf16.xpose.msra.mxu0 %v1714_v3 }
 0x3b5   :  { %1356 = vmatprep.subr.bf16.mxu0 %v1719_v4 }
 0x3bc   :  { %1357 = vmatpush1.bf16.xpose.msra.mxu0 %v1717_v9 }
 0x3bd   :  { %1358 = vmatprep.subr.bf16.mxu0 %v1722_v14 }
 0x3c4   :  { %1359 = vmatpush1.bf16.xpose.msra.mxu0 %v1720_v17 }
 0x3cb   :  { %1361 = vmatmul.mubr.bf16.vlgmr.msra.gmra.mrb[4].mxu0 %v592_v23 }
 0x49e   :  { %v1362_v24 = vpop.f32.mrb[4].mxu0 }
 0x49f   :  { %v1364_v29 = vpop.f32.mrb[5].mxu0 }
 0x4a0   :  { %v1371_v30 = vcombine.low %v1362_v24, %v1364_v29  ;;  %v1366_v35 = vpop.f32.mrb[6].mxu0 }
 0x4a1   :  { %v1367_v36 = vpop.f32.mrb[7].mxu0 }
 0x4a2   :  { %1566 = vst.sshfl [vmem:[#allocation8] sm:$0x33 pattern:$0x76325410] %v1371_v30 }
 0x4a3   :  { %1778 = shalt.err (!%p1775_p6)
}
 0x4a4   :  { %s1779_s10 = scalar_lea.hbm %s2171_s2, 64 }
 0x4a5   :  { %p1780_p7 = scmp.ne.s32.totalorder %s2171_s2, %s1779_s10  ;;  %p1783_p8 = scmp.lt.u32.totalorder %s1779_s10, %s2171_s2 }
 0x4a7   :  { %p1785_p9 = pnand %p1783_p8, %p1780_p7 }
 0x4a9   :  { %1788 = shalt.err (!%p1785_p9)
}
 0x4aa   :  { %1390 = dma.vmem_to_hbm [thread:$0]  %s1388_s6, 64, %s2171_s2, [#allocation5]  }
 0x4ab   :  { %1793 = dma.done.wait [#allocation5], 64  }
 0x4ac   :  { %1794 = vsyncadd [#allocation5], 4294967232 }
 0x4ad   :  { %1394 = vsyncpa [#allocation4], 1 }
 0x4ae   :  { %1395 = vsyncpa [#allocation7], 1 }
 0x4af   :  { %1396 = vsyncpa [#allocation5], 1 }

// kernel: tpu_custom_call.1
= control target key start
LH: loop header
LB: loop body
LE: loop exit
PB: predicated region body
PF: predicated region fallthrough
CT: control target
= control target key end

     0   :  { %7 = vsyncpa [#allocation4], 0  ;;  %s2169_s0 = inlined_call_operand.hbm [shape: bf16[2,256], index: 0, kind: input, shape index: {}]   ;;  %s2170_s1 = inlined_call_operand.hbm [shape: bf16[3,256,256], index: 1, kind: input, shape index: {}]   ;;  %s2171_s2 = inlined_call_operand.hbm [shape: f32[2,256], index: 2, kind: output, shape index: {}]  }
   0x1   :  { %8 = vsyncpa [#allocation7], 0 }
   0x2   :  { %9 = vsyncpa [#allocation5], 0  ;;  %s1795_s9 = smov [#allocation3]   ;;  %s1796_s11 = smov [#allocation6]  }
   0x3   :  { %s16_s10 = sshll.u32 %s1795_s9, 4  ;;  %s25_s12 = sshll.u32 %s1796_s11, 4  ;;  %s17_s10 = int_to_ptr.vmem [resolvable:$true] %s16_s10  ;;  %s1818_s12 = int_to_ptr.vmem [resolvable:$true] %s25_s12 }
   0x4   :  { %s1723_s15 = scalar_lea.hbm %s2169_s0, 32 }
   0x5   :  { %p1724_p0 = scmp.ne.s32.totalorder %s2169_s0, %s1723_s15  ;;  %p1727_p1 = scmp.lt.u32.totalorder %s1723_s15, %s2169_s0 }
   0x7   :  { %p1729_p2 = pnand %p1727_p1, %p1724_p0 }
   0x9   :  { %1732 = shalt.err (!%p1729_p2)
}
   0xa   :  { %s1733_s20 = scalar_lea.vmem %s17_s10, 32  ;;  %p1738_p4 = scmp.lt.s32.totalorder %s17_s10, %s17_s10 }
   0xb   :  { %p1734_p3 = scmp.ne.s32.totalorder %s17_s10, %s1733_s20  ;;  %p1739_p5 = scmp.lt.s32.totalorder %s1733_s20, %s1733_s20 }
   0xd   :  { %p1740_p6 = por %p1739_p5, %p1738_p4 }
   0xf   :  { %p1741_p7 = pnand %p1740_p6, %p1734_p3 }
  0x11   :  { %1744 = shalt.err (!%p1741_p7)
}
  0x12   :  { %19 = dma.hbm_to_vmem [thread:$0]  %s2169_s0, 32, %s17_s10, [#allocation4]  }
  0x13   :  { %s1745_s25 = scalar_lea.hbm %s2170_s1, 12288 }
  0x14   :  { %p1746_p8 = scmp.ne.s32.totalorder %s2170_s1, %s1745_s25  ;;  %p1749_p9 = scmp.lt.u32.totalorder %s1745_s25, %s2170_s1 }
  0x16   :  { %p1751_p10 = pnand %p1749_p9, %p1746_p8 }
  0x18   :  { %1754 = shalt.err (!%p1751_p10)
}
  0x19   :  { %s1755_s30 = scalar_lea.vmem %s1818_s12, 12288  ;;  %p1760_p12 = scmp.lt.s32.totalorder %s1818_s12, %s1818_s12 }
  0x1a   :  { %p1756_p11 = scmp.ne.s32.totalorder %s1818_s12, %s1755_s30  ;;  %p1761_p13 = scmp.lt.s32.totalorder %s1755_s30, %s1755_s30 }
  0x1c   :  { %p1762_p0 = por %p1761_p13, %p1760_p12 }
  0x1e   :  { %p1763_p1 = pnand %p1762_p0, %p1756_p11 }
  0x20   :  { %1766 = shalt.err (!%p1763_p1)
}
  0x21   :  { %s1797_s0 = smov 128   ;;  %s1798_s3 = smov 8  }
  0x22   :  { %31 = dma.hbm_to_vmem [thread:$0]  %s2170_s1, 12288, %s1818_s12, [#allocation7], %s1797_s0, %s1797_s0, %s1798_s3  }
  0x23   :  { %1789 = dma.done.wait [#allocation4], 32  }
  0x24   :  { %1790 = vsyncadd [#allocation4], 4294967264 }
  0x25   :  { %1791 = dma.done.wait [#allocation7], 12288  }
  0x26   :  { %1792 = vsyncadd [#allocation7], 4294955008  ;;  %v1849_v0 = vld [vmem:[#allocation6 + $0x4] ss:$8 sps:$4 sm:$0xff]   ;;  %v1851_v1 = vld [vmem:[#allocation6] ss:$8 sps:$4 sm:$0xff]   ;;  %v83_v7 = vlaneseq }
  0x27   :  { %256 = vmatprep.subr.bf16.mxu1 %v1849_v0  ;;  %v1854_v2 = vld [vmem:[#allocation6 + $0x14] ss:$8 sps:$4 sm:$0xff]   ;;  %v1858_v3 = vld [vmem:[#allocation6 + $0x10] ss:$8 sps:$4 sm:$0xff]   ;;  %v1860_v4 = vld [vmem:[#allocation6 + $0x24] ss:$8 sps:$4 sm:$0xff]  }
  0x28   :  { %257 = vmatpush1.bf16.xpose.msra.mxu1 %v1851_v1  ;;  %v1799_v5 = vmov 1966171168   ;;  %v1864_v8 = vld [vmem:[#allocation6 + $0x20] ss:$8 sps:$4 sm:$0xff]   ;;  %v1866_v9 = vld [vmem:[#allocation6 + $0x34] ss:$8 sps:$4 sm:$0xff]  }
  0x29   :  { %258 = vmatprep.subr.bf16.mxu1 %v1854_v2  ;;  %v81_v6 = vunpack.c.l.s4 %v1799_v5  ;;  %v1868_v11 = vshrl.u32 %v83_v7, 7  ;;  %v1875_v13 = vld.sshfl [vmem:[#allocation3] sm:$0x11 pattern:$0x75316420]  ;;  %s1802_s1 = smov [#allocation8]  }
  0x2a   :  { %v1877_v14 = vld [vmem:[#allocation6 + $0x30] ss:$8 sps:$4 sm:$0xff]   ;;  %v79_v15 = vcombine.high %v1875_v13, %v1875_v13  ;;  %v1881_v16 = vld [vmem:[#allocation6 + $0x104] ss:$8 sps:$4 sm:$0xff]   ;;  %v1886_v19 = vld [vmem:[#allocation6 + $0x100] ss:$8 sps:$4 sm:$0xff]  }
  0x2b   :  { %v82_v10 = vunpack.c.0.s8 %v81_v6  ;;  %2176 = vst [vmem:[#allocation12_spill] sm:$0xff] %v1868_v11  ;;  %v1883_v17 = vld [vmem:[#allocation6 + $0x44] ss:$8 sps:$4 sm:$0xff]   ;;  %v1888_v20 = vld [vmem:[#allocation6 + $0x114] ss:$8 sps:$4 sm:$0xff]   ;;  %819 = vmatprep.subr.bf16.mxu0 %v1881_v16  ;;  %s1387_s6 = sshll.u32 %s1802_s1, 4  ;;  %s1388_s6 = int_to_ptr.vmem [resolvable:$true] %s1387_s6 }
  0x2c   :  { %820 = vmatpush1.bf16.msra.mxu0 %v1886_v19  ;;  %v1895_v21 = vld [vmem:[#allocation6 + $0x110] ss:$8 sps:$4 sm:$0xff]   ;;  %v1897_v22 = vld [vmem:[#allocation6 + $0x124] ss:$8 sps:$4 sm:$0xff]   ;;  %v1899_v23 = vld [vmem:[#allocation6 + $0x40] ss:$8 sps:$4 sm:$0xff]   ;;  %p1772_p3 = scmp.lt.s32.totalorder %s1388_s6, %s1388_s6 }
  0x2d   :  { %v1873_v12 = vsub.s32 %v82_v10, %v1868_v11  ;;  %821 = vmatprep.subr.bf16.mxu0 %v1888_v20  ;;  %v1901_v24 = vld [vmem:[#allocation6 + $0x54] ss:$8 sps:$4 sm:$0xff]   ;;  %v1903_v25 = vld [vmem:[#allocation6 + $0x120] ss:$8 sps:$4 sm:$0xff]   ;;  %v1911_v27 = vld [vmem:[#allocation6 + $0x130] ss:$8 sps:$4 sm:$0xff]  }
  0x2e   :  { %v1906_v26 = vld [vmem:[#allocation6 + $0x134] ss:$8 sps:$4 sm:$0xff]   ;;  %v1913_v28 = vld [vmem:[#allocation6 + $0x144] ss:$8 sps:$4 sm:$0xff]   ;;  %v1917_v29 = vld [vmem:[#allocation6 + $0x50] ss:$8 sps:$4 sm:$0xff]  }
  0x2f   :  { %v93_v18 = vrot.slane %v79_v15, %v1873_v12  ;;  %v1919_v30 = vld [vmem:[#allocation6 + $0x64] ss:$8 sps:$4 sm:$0xff]   ;;  %v1921_v31 = vld [vmem:[#allocation6 + $0x140] ss:$8 sps:$4 sm:$0xff]   ;;  %v1924_v32 = vld [vmem:[#allocation6 + $0x154] ss:$8 sps:$4 sm:$0xff]  }
  0x30   :  { %259 = vmatpush1.bf16.xpose.msra.mxu1 %v1858_v3  ;;  %822 = vmatpush1.bf16.msra.mxu0 %v1895_v21  ;;  %v1929_v33 = vld [vmem:[#allocation6 + $0x150] ss:$8 sps:$4 sm:$0xff]   ;;  %v1931_v34 = vld [vmem:[#allocation6 + $0x164] ss:$8 sps:$4 sm:$0xff]   ;;  %v1935_v35 = vld [vmem:[#allocation6 + $0x60] ss:$8 sps:$4 sm:$0xff]  }
  0x31   :  { %260 = vmatprep.subr.bf16.mxu1 %v1860_v4  ;;  %288 = vmatprep.mubr.bf16.mxu1 %v93_v18  ;;  %v1939_v36 = vld [vmem:[#allocation6 + $0x74] ss:$8 sps:$4 sm:$0xff]   ;;  %v1941_v37 = vld [vmem:[#allocation6 + $0x160] ss:$8 sps:$4 sm:$0xff]   ;;  %v1948_v39 = vld [vmem:[#allocation6 + $0x170] ss:$8 sps:$4 sm:$0xff]  }
  0x32   :  { %851 = vmatprep.mubr.bf16.mxu0 %v93_v18  ;;  %823 = vmatprep.subr.bf16.mxu0 %v1897_v22  ;;  %v1945_v38 = vld [vmem:[#allocation6 + $0x174] ss:$8 sps:$4 sm:$0xff]   ;;  %v1952_v40 = vld [vmem:[#allocation6 + $0x70] ss:$8 sps:$4 sm:$0xff]   ;;  %v1954_v41 = vld [vmem:[#allocation6 + $0x84] ss:$8 sps:$4 sm:$0xff]  }
  0x33   :  { %v1957_v42 = vld [vmem:[#allocation6 + $0x184] ss:$8 sps:$4 sm:$0xff]   ;;  %v1960_v43 = vld [vmem:[#allocation6 + $0x180] ss:$8 sps:$4 sm:$0xff]   ;;  %v1966_v45 = vld [vmem:[#allocation6 + $0x94] ss:$8 sps:$4 sm:$0xff]  }
  0x34   :  { %824 = vmatpush1.bf16.msra.mxu0 %v1903_v25  ;;  %v1964_v44 = vld [vmem:[#allocation6 + $0x80] ss:$8 sps:$4 sm:$0xff]   ;;  %v1969_v46 = vld [vmem:[#allocation6 + $0x194] ss:$8 sps:$4 sm:$0xff]   ;;  %v1972_v47 = vld [vmem:[#allocation6 + $0x190] ss:$8 sps:$4 sm:$0xff]  }
  0x35   :  { %825 = vmatprep.subr.bf16.mxu0 %v1906_v26  ;;  %v1976_v48 = vld [vmem:[#allocation6 + $0x90] ss:$8 sps:$4 sm:$0xff]   ;;  %v1978_v49 = vld [vmem:[#allocation6 + $0xa4] ss:$8 sps:$4 sm:$0xff]   ;;  %v1984_v51 = vld [vmem:[#allocation6 + $0x1a0] ss:$8 sps:$4 sm:$0xff]  }
  0x36   :  { %v1981_v50 = vld [vmem:[#allocation6 + $0x1a4] ss:$8 sps:$4 sm:$0xff]   ;;  %v1988_v52 = vld [vmem:[#allocation6 + $0xa0] ss:$8 sps:$4 sm:$0xff]   ;;  %v1990_v53 = vld [vmem:[#allocation6 + $0xb4] ss:$8 sps:$4 sm:$0xff]  }
  0x37   :  { %v1993_v54 = vld [vmem:[#allocation6 + $0x1b4] ss:$8 sps:$4 sm:$0xff]   ;;  %v1996_v55 = vld [vmem:[#allocation6 + $0x1b0] ss:$8 sps:$4 sm:$0xff]   ;;  %v2002_v57 = vld [vmem:[#allocation6 + $0xc4] ss:$8 sps:$4 sm:$0xff]  }
  0x38   :  { %261 = vmatpush1.bf16.xpose.msra.mxu1 %v1864_v8  ;;  %826 = vmatpush1.bf16.msra.mxu0 %v1911_v27  ;;  %v2000_v56 = vld [vmem:[#allocation6 + $0xb0] ss:$8 sps:$4 sm:$0xff]   ;;  %v2005_v58 = vld [vmem:[#allocation6 + $0x1c4] ss:$8 sps:$4 sm:$0xff]   ;;  %v2008_v59 = vld [vmem:[#allocation6 + $0x1c0] ss:$8 sps:$4 sm:$0xff]  }
  0x39   :  { %262 = vmatprep.subr.bf16.mxu1 %v1866_v9  ;;  %827 = vmatprep.subr.bf16.mxu0 %v1913_v28  ;;  %v2012_v60 = vld [vmem:[#allocation6 + $0xc0] ss:$8 sps:$4 sm:$0xff]   ;;  %v2014_v61 = vld [vmem:[#allocation6 + $0xd4] ss:$8 sps:$4 sm:$0xff]   ;;  %v2020_v63 = vld [vmem:[#allocation6 + $0x1d0] ss:$8 sps:$4 sm:$0xff]  }
  0x3a   :  { %v2017_v62 = vld [vmem:[#allocation6 + $0x1d4] ss:$8 sps:$4 sm:$0xff]   ;;  %2178 = vst [vmem:[#allocation14_spill] sm:$0xff] %v2020_v63  ;;  %v2024_v5 = vld [vmem:[#allocation6 + $0xd0] ss:$8 sps:$4 sm:$0xff]   ;;  %s1767_s7 = scalar_lea.vmem %s1388_s6, 64 }
  0x3b   :  { %2177 = vst [vmem:[#allocation13_spill] sm:$0xff] %v2017_v62  ;;  %v2026_v6 = vld [vmem:[#allocation6 + $0xe4] ss:$8 sps:$4 sm:$0xff]   ;;  %v2032_v10 = vld [vmem:[#allocation6 + $0x1e0] ss:$8 sps:$4 sm:$0xff]   ;;  %p1768_p2 = scmp.ne.s32.totalorder %s1388_s6, %s1767_s7  ;;  %p1773_p4 = scmp.lt.s32.totalorder %s1767_s7, %s1767_s7 }
  0x3c   :  { %828 = vmatpush1.bf16.msra.mxu0 %v1921_v31  ;;  %v2029_v7 = vld [vmem:[#allocation6 + $0x1e4] ss:$8 sps:$4 sm:$0xff]   ;;  %2179 = vst [vmem:[#allocation15_spill] sm:$0xff] %v2032_v10  ;;  %v2036_v15 = vld [vmem:[#allocation6 + $0xe0] ss:$8 sps:$4 sm:$0xff]  }
  0x3d   :  { %829 = vmatprep.subr.bf16.mxu0 %v1924_v32  ;;  %v2038_v18 = vld [vmem:[#allocation6 + $0xf4] ss:$8 sps:$4 sm:$0xff]   ;;  %p1774_p5 = por %p1773_p4, %p1772_p3 }
  0x3e   :  { %v2041_v11 = vld [vmem:[#allocation6 + $0x1f4] ss:$8 sps:$4 sm:$0xff]  }
  0x3f   :  { %p1775_p6 = pnand %p1774_p5, %p1768_p2 }
  0x40   :  { %263 = vmatpush1.bf16.xpose.msra.mxu1 %v1877_v14  ;;  %830 = vmatpush1.bf16.msra.mxu0 %v1929_v33 }
  0x41   :  { %264 = vmatprep.subr.bf16.mxu1 %v1883_v17  ;;  %831 = vmatprep.subr.bf16.mxu0 %v1931_v34 }
  0x44   :  { %832 = vmatpush1.bf16.msra.mxu0 %v1941_v37 }
  0x45   :  { %833 = vmatprep.subr.bf16.mxu0 %v1945_v38 }
  0x48   :  { %265 = vmatpush1.bf16.xpose.msra.mxu1 %v1899_v23  ;;  %834 = vmatpush1.bf16.msra.mxu0 %v1948_v39 }
  0x49   :  { %266 = vmatprep.subr.bf16.mxu1 %v1901_v24  ;;  %835 = vmatprep.subr.bf16.mxu0 %v1957_v42 }
  0x4c   :  { %836 = vmatpush1.bf16.msra.mxu0 %v1960_v43 }
  0x4d   :  { %837 = vmatprep.subr.bf16.mxu0 %v1969_v46 }
  0x50   :  { %267 = vmatpush1.bf16.xpose.msra.mxu1 %v1917_v29  ;;  %838 = vmatpush1.bf16.msra.mxu0 %v1972_v47 }
  0x51   :  { %268 = vmatprep.subr.bf16.mxu1 %v1919_v30  ;;  %839 = vmatprep.subr.bf16.mxu0 %v1981_v50 }
  0x54   :  { %840 = vmatpush1.bf16.msra.mxu0 %v1984_v51 }
  0x55   :  { %841 = vmatprep.subr.bf16.mxu0 %v1993_v54 }
  0x58   :  { %269 = vmatpush1.bf16.xpose.msra.mxu1 %v1935_v35  ;;  %842 = vmatpush1.bf16.msra.mxu0 %v1996_v55 }
  0x59   :  { %270 = vmatprep.subr.bf16.mxu1 %v1939_v36  ;;  %843 = vmatprep.subr.bf16.mxu0 %v2005_v58 }
  0x5c   :  { %844 = vmatpush1.bf16.msra.mxu0 %v2008_v59 }
  0x5d   :  { %845 = vmatprep.subr.bf16.mxu0 %v2017_v62  ;;  %v2048_v62 = vld [vmem:[#allocation6 + $0xf0] ss:$8 sps:$4 sm:$0xff]  }
  0x60   :  { %271 = vmatpush1.bf16.xpose.msra.mxu1 %v1952_v40  ;;  %846 = vmatpush1.bf16.msra.mxu0 %v2020_v63  ;;  %v2044_v63 = vld [vmem:[#allocation6 + $0x1f0] ss:$8 sps:$4 sm:$0xff]  }
  0x61   :  { %272 = vmatprep.subr.bf16.mxu1 %v1954_v41  ;;  %847 = vmatprep.subr.bf16.mxu0 %v2029_v7 }
  0x64   :  { %848 = vmatpush1.bf16.msra.mxu0 %v2032_v10  ;;  %v86_v10 = vrot.slane %v1875_v13, %v1873_v12  ;;  %v2180_v13 = vld [vmem:[#allocation13_spill] sm:$0xff] }
  0x65   :  { %849 = vmatprep.subr.bf16.mxu0 %v2041_v11 }
  0x68   :  { %273 = vmatpush1.bf16.xpose.msra.mxu1 %v1964_v44  ;;  %850 = vmatpush1.bf16.msra.mxu0 %v2044_v63 }
  0x69   :  { %274 = vmatprep.subr.bf16.mxu1 %v1966_v45  ;;  %1127 = vmatprep.subr.bf16.mxu0 %v1849_v0 }
  0x6b   :  { %852 = vmatmul.mubr.bf16.vlgmr.msra.gmra.mrb[0].mxu0 %v86_v10 }
  0x6c   :  { %1128 = vmatpush1.bf16.msra.mxu0 %v1851_v1 }
  0x6d   :  { %1129 = vmatprep.subr.bf16.mxu0 %v1854_v2 }
  0x70   :  { %275 = vmatpush1.bf16.xpose.msra.mxu1 %v1976_v48  ;;  %1130 = vmatpush1.bf16.msra.mxu0 %v1858_v3 }
  0x71   :  { %276 = vmatprep.subr.bf16.mxu1 %v1978_v49  ;;  %1131 = vmatprep.subr.bf16.mxu0 %v1860_v4 }
  0x74   :  { %1132 = vmatpush1.bf16.msra.mxu0 %v1864_v8 }
  0x75   :  { %1133 = vmatprep.subr.bf16.mxu0 %v1866_v9 }
  0x78   :  { %277 = vmatpush1.bf16.xpose.msra.mxu1 %v1988_v52  ;;  %1134 = vmatpush1.bf16.msra.mxu0 %v1877_v14 }
  0x79   :  { %278 = vmatprep.subr.bf16.mxu1 %v1990_v53  ;;  %1135 = vmatprep.subr.bf16.mxu0 %v1883_v17 }
  0x7c   :  { %1136 = vmatpush1.bf16.msra.mxu0 %v1899_v23 }
  0x7d   :  { %1137 = vmatprep.subr.bf16.mxu0 %v1901_v24 }
  0x80   :  { %279 = vmatpush1.bf16.xpose.msra.mxu1 %v2000_v56  ;;  %1138 = vmatpush1.bf16.msra.mxu0 %v1917_v29 }
  0x81   :  { %280 = vmatprep.subr.bf16.mxu1 %v2002_v57  ;;  %1139 = vmatprep.subr.bf16.mxu0 %v1919_v30 }
  0x84   :  { %1140 = vmatpush1.bf16.msra.mxu0 %v1935_v35 }
  0x85   :  { %1141 = vmatprep.subr.bf16.mxu0 %v1939_v36 }
  0x88   :  { %281 = vmatpush1.bf16.xpose.msra.mxu1 %v2012_v60  ;;  %1142 = vmatpush1.bf16.msra.mxu0 %v1952_v40 }
  0x89   :  { %282 = vmatprep.subr.bf16.mxu1 %v2014_v61  ;;  %1143 = vmatprep.subr.bf16.mxu0 %v1954_v41 }
  0x8c   :  { %1144 = vmatpush1.bf16.msra.mxu0 %v1964_v44 }
  0x8d   :  { %1145 = vmatprep.subr.bf16.mxu0 %v1966_v45 }
  0x90   :  { %283 = vmatpush1.bf16.xpose.msra.mxu1 %v2024_v5  ;;  %1146 = vmatpush1.bf16.msra.mxu0 %v1976_v48 }
  0x91   :  { %284 = vmatprep.subr.bf16.mxu1 %v2026_v6  ;;  %1147 = vmatprep.subr.bf16.mxu0 %v1978_v49 }
  0x94   :  { %1148 = vmatpush1.bf16.msra.mxu0 %v1988_v52 }
  0x95   :  { %1149 = vmatprep.subr.bf16.mxu0 %v1990_v53 }
  0x98   :  { %285 = vmatpush1.bf16.xpose.msra.mxu1 %v2036_v15  ;;  %1150 = vmatpush1.bf16.msra.mxu0 %v2000_v56 }
  0x99   :  { %286 = vmatprep.subr.bf16.mxu1 %v2038_v18  ;;  %1151 = vmatprep.subr.bf16.mxu0 %v2002_v57 }
  0x9c   :  { %1152 = vmatpush1.bf16.msra.mxu0 %v2012_v60 }
  0x9d   :  { %1153 = vmatprep.subr.bf16.mxu0 %v2014_v61 }
  0xa0   :  { %287 = vmatpush1.bf16.xpose.msra.mxu1 %v2048_v62  ;;  %1154 = vmatpush1.bf16.msra.mxu0 %v2024_v5 }
  0xa1   :  { %521 = vmatprep.subr.bf16.mxu1 %v1881_v16  ;;  %1155 = vmatprep.subr.bf16.mxu0 %v2026_v6  ;;  %v2181_v16 = vld [vmem:[#allocation14_spill] sm:$0xff] }
  0xa4   :  { %1156 = vmatpush1.bf16.msra.mxu0 %v2036_v15 }
  0xa5   :  { %1157 = vmatprep.subr.bf16.mxu0 %v2038_v18 }
  0xa7   :  { %289 = vmatmul.mubr.bf16.vlgmr.msra.gmra.mrb[0].mxu1 %v86_v10  ;;  %v1681_v10 = vld [vmem:[#allocation6 + $0x220] ss:$8 sps:$4 sm:$0xff]  }
  0xa8   :  { %522 = vmatpush1.bf16.xpose.msra.mxu1 %v1886_v19  ;;  %1158 = vmatpush1.bf16.msra.mxu0 %v2048_v62  ;;  %v2182_v19 = vld [vmem:[#allocation15_spill] sm:$0xff] }
  0xa9   :  { %523 = vmatprep.subr.bf16.mxu1 %v1888_v20 }
  0xb0   :  { %524 = vmatpush1.bf16.xpose.msra.mxu1 %v1895_v21 }
  0xb1   :  { %525 = vmatprep.subr.bf16.mxu1 %v1897_v22 }
  0xb8   :  { %526 = vmatpush1.bf16.xpose.msra.mxu1 %v1903_v25 }
  0xb9   :  { %527 = vmatprep.subr.bf16.mxu1 %v1906_v26 }
  0xc0   :  { %528 = vmatpush1.bf16.xpose.msra.mxu1 %v1911_v27 }
  0xc1   :  { %529 = vmatprep.subr.bf16.mxu1 %v1913_v28  ;;  %v1800_v28 = vmov 0.0  }
  0xc8   :  { %530 = vmatpush1.bf16.xpose.msra.mxu1 %v1921_v31 }
  0xc9   :  { %531 = vmatprep.subr.bf16.mxu1 %v1924_v32 }
  0xd0   :  { %532 = vmatpush1.bf16.xpose.msra.mxu1 %v1929_v33 }
  0xd1   :  { %533 = vmatprep.subr.bf16.mxu1 %v1931_v34 }
  0xd8   :  { %534 = vmatpush1.bf16.xpose.msra.mxu1 %v1941_v37 }
  0xd9   :  { %535 = vmatprep.subr.bf16.mxu1 %v1945_v38 }
  0xe0   :  { %536 = vmatpush1.bf16.xpose.msra.mxu1 %v1948_v39 }
  0xe1   :  { %537 = vmatprep.subr.bf16.mxu1 %v1957_v42  ;;  %v2183_v42 = vld [vmem:[#allocation12_spill] sm:$0xff] }
  0xe8   :  { %538 = vmatpush1.bf16.xpose.msra.mxu1 %v1960_v43 }
  0xe9   :  { %539 = vmatprep.subr.bf16.mxu1 %v1969_v46 }
  0xf0   :  { %540 = vmatpush1.bf16.xpose.msra.mxu1 %v1972_v47 }
  0xf1   :  { %541 = vmatprep.subr.bf16.mxu1 %v1981_v50  ;;  %v1677_v50 = vld [vmem:[#allocation6 + $0x204] ss:$8 sps:$4 sm:$0xff]  }
  0xf2   :  { %1328 = vmatprep.subr.bf16.mxu0 %v1677_v50 }
  0xf8   :  { %542 = vmatpush1.bf16.xpose.msra.mxu1 %v1984_v51 }
  0xf9   :  { %543 = vmatprep.subr.bf16.mxu1 %v1993_v54 }
 0x100   :  { %544 = vmatpush1.bf16.xpose.msra.mxu1 %v1996_v55 }
 0x101   :  { %545 = vmatprep.subr.bf16.mxu1 %v2005_v58 }
 0x108   :  { %546 = vmatpush1.bf16.xpose.msra.mxu1 %v2008_v59 }
 0x109   :  { %547 = vmatprep.subr.bf16.mxu1 %v2180_v13  ;;  %v1689_v13 = vld [vmem:[#allocation6 + $0x244] ss:$8 sps:$4 sm:$0xff]  }
 0x110   :  { %548 = vmatpush1.bf16.xpose.msra.mxu1 %v2181_v16  ;;  %v1687_v16 = vld [vmem:[#allocation6 + $0x240] ss:$8 sps:$4 sm:$0xff]  }
 0x111   :  { %549 = vmatprep.subr.bf16.mxu1 %v2029_v7  ;;  %v1683_v7 = vld [vmem:[#allocation6 + $0x224] ss:$8 sps:$4 sm:$0xff]  }
 0x118   :  { %550 = vmatpush1.bf16.xpose.msra.mxu1 %v2182_v19  ;;  %v1692_v19 = vld [vmem:[#allocation6 + $0x254] ss:$8 sps:$4 sm:$0xff]  }
 0x119   :  { %551 = vmatprep.subr.bf16.mxu1 %v2041_v11 }
 0x120   :  { %552 = vmatpush1.bf16.xpose.msra.mxu1 %v2044_v63  ;;  %v1680_v63 = vld [vmem:[#allocation6 + $0x214] ss:$8 sps:$4 sm:$0xff]  }
 0x121   :  { %1069 = vmatprep.subr.bf16.mxu1 %v1849_v0 }
 0x13e   :  { %v853_v0 = vpop.f32.mrb[0].mxu0 }
 0x17a   :  { %v290_v20 = vpop.f32.mrb[0].mxu1 }
 0x17b   :  { %v297_v21 = vmax.f32 %v290_v20, 0.0  ;;  %v292_v22 = vpop.f32.mrb[1].mxu1  ;;  %v1690_v20 = vld [vmem:[#allocation6 + $0x250] ss:$8 sps:$4 sm:$0xff]  }
 0x17c   :  { %v298_v25 = vmax.f32 %v292_v22, 0.0  ;;  %v294_v26 = vpop.f32.mrb[2].mxu1  ;;  %v1693_v22 = vld [vmem:[#allocation6 + $0x260] ss:$8 sps:$4 sm:$0xff]  }
 0x17d   :  { %vm299_vm0 = vcmp.gt.f32.partialorder %v297_v21, 0.0  ;;  %v295_v27 = vpop.f32.mrb[3].mxu1  ;;  %v326_v33 = vpack.c.bf16 %v297_v21, %v297_v21  ;;  %v1695_v21 = vld [vmem:[#allocation6 + $0x264] ss:$8 sps:$4 sm:$0xff]   ;;  %v1696_v26 = vld [vmem:[#allocation6 + $0x270] ss:$8 sps:$4 sm:$0xff]  }
 0x17e   :  { %v1430_v31 = vsel %vm299_vm0, 1.0, %v1800_v28  ;;  %vm300_vm1 = vcmp.gt.f32.partialorder %v298_v25, 0.0  ;;  %v327_v32 = vpack.c.bf16 %v298_v25, %v298_v25  ;;  %v1698_v25 = vld [vmem:[#allocation6 + $0x274] ss:$8 sps:$4 sm:$0xff]   ;;  %v1701_v27 = vld [vmem:[#allocation6 + $0x284] ss:$8 sps:$4 sm:$0xff]  }
 0x17f   :  { %v1431_v34 = vsel %vm300_vm1, 1.0, %v1800_v28 }
 0x180   :  { %v1432_v37 = vpack.c.bf16 %v1431_v34, %v1430_v31  ;;  %553 = vmatprep.mubr.bf16.mxu1 %v327_v32  ;;  %v1704_v31 = vld [vmem:[#allocation6 + $0x294] ss:$8 sps:$4 sm:$0xff]   ;;  %v1702_v32 = vld [vmem:[#allocation6 + $0x290] ss:$8 sps:$4 sm:$0xff]   ;;  %v1705_v34 = vld [vmem:[#allocation6 + $0x2a0] ss:$8 sps:$4 sm:$0xff]  }
 0x181   :  { %554 = vmatmul.mubr.bf16.vlgmr.msra.gmra.mrb[4].mxu1 %v326_v33  ;;  %v1707_v33 = vld [vmem:[#allocation6 + $0x2a4] ss:$8 sps:$4 sm:$0xff]  }
 0x182   :  { %v316_v11 = vrot.slane %v1432_v37, %v1873_v12  ;;  %1070 = vmatpush1.bf16.msra.mxu1 %v1851_v1  ;;  %v855_v1 = vpop.f32.mrb[1].mxu0  ;;  %v1710_v37 = vld [vmem:[#allocation6 + $0x2b4] ss:$8 sps:$4 sm:$0xff]  }
 0x183   :  { %1071 = vmatprep.subr.bf16.mxu1 %v1854_v2  ;;  %v857_v2 = vpop.f32.mrb[2].mxu0 }
 0x184   :  { %1433 = vst.sshfl [vmem:[#allocation2] sm:$0x5 pattern:$0x73625140] %v316_v11  ;;  %v1708_v11 = vld [vmem:[#allocation6 + $0x2b0] ss:$8 sps:$4 sm:$0xff]  }
 0x185   :  { %v1716_v2 = vld [vmem:[#allocation6 + $0x2d4] ss:$8 sps:$4 sm:$0xff]  }
 0x186   :  { %1072 = vmatpush1.bf16.msra.mxu1 %v1858_v3  ;;  %v858_v3 = vpop.f32.mrb[3].mxu0 }
 0x187   :  { %1073 = vmatprep.subr.bf16.mxu1 %v1860_v4  ;;  %v1714_v3 = vld [vmem:[#allocation6 + $0x2d0] ss:$8 sps:$4 sm:$0xff]  }
 0x18a   :  { %1074 = vmatpush1.bf16.msra.mxu1 %v1864_v8 }
 0x18b   :  { %1075 = vmatprep.subr.bf16.mxu1 %v1866_v9  ;;  %v1110_v51 = vld [vmem:[#allocation2] sm:$0x3] }
 0x18e   :  { %1076 = vmatpush1.bf16.msra.mxu1 %v1877_v14 }
 0x18f   :  { %1077 = vmatprep.subr.bf16.mxu1 %v1883_v17 }
 0x192   :  { %1078 = vmatpush1.bf16.msra.mxu1 %v1899_v23 }
 0x193   :  { %1079 = vmatprep.subr.bf16.mxu1 %v1901_v24 }
 0x196   :  { %1080 = vmatpush1.bf16.msra.mxu1 %v1917_v29 }
 0x197   :  { %1081 = vmatprep.subr.bf16.mxu1 %v1919_v30 }
 0x19a   :  { %1082 = vmatpush1.bf16.msra.mxu1 %v1935_v35 }
 0x19b   :  { %1083 = vmatprep.subr.bf16.mxu1 %v1939_v36  ;;  %v1801_v36 = vmov 1983009808  }
 0x19c   :  { %v864_v38 = vunpack.c.l.s4 %v1801_v36 }
 0x19e   :  { %1084 = vmatpush1.bf16.msra.mxu1 %v1952_v40  ;;  %v865_v39 = vunpack.c.0.s8 %v864_v38 }
 0x19f   :  { %1085 = vmatprep.subr.bf16.mxu1 %v1954_v41 }
 0x1a0   :  { %v868_v43 = vsub.s32 %v865_v39, %v2183_v42 }
 0x1a2   :  { %1086 = vmatpush1.bf16.msra.mxu1 %v1964_v44 }
 0x1a3   :  { %1087 = vmatprep.subr.bf16.mxu1 %v1966_v45 }
 0x1a6   :  { %1088 = vmatpush1.bf16.msra.mxu1 %v1976_v48 }
 0x1a7   :  { %1089 = vmatprep.subr.bf16.mxu1 %v1978_v49 }
 0x1aa   :  { %1090 = vmatpush1.bf16.msra.mxu1 %v1988_v52 }
 0x1ab   :  { %1091 = vmatprep.subr.bf16.mxu1 %v1990_v53 }
 0x1ae   :  { %1092 = vmatpush1.bf16.msra.mxu1 %v2000_v56 }
 0x1af   :  { %1093 = vmatprep.subr.bf16.mxu1 %v2002_v57 }
 0x1b2   :  { %1094 = vmatpush1.bf16.msra.mxu1 %v2012_v60 }
 0x1b3   :  { %1095 = vmatprep.subr.bf16.mxu1 %v2014_v61  ;;  %v1675_v61 = vld [vmem:[#allocation6 + $0x200] ss:$8 sps:$4 sm:$0xff]  }
 0x1b6   :  { %1096 = vmatpush1.bf16.msra.mxu1 %v2024_v5 }
 0x1b7   :  { %1097 = vmatprep.subr.bf16.mxu1 %v2026_v6  ;;  %v1678_v6 = vld [vmem:[#allocation6 + $0x210] ss:$8 sps:$4 sm:$0xff]  }
 0x1ba   :  { %1098 = vmatpush1.bf16.msra.mxu1 %v2036_v15  ;;  %v1686_v15 = vld [vmem:[#allocation6 + $0x234] ss:$8 sps:$4 sm:$0xff]  }
 0x1bb   :  { %1099 = vmatprep.subr.bf16.mxu1 %v2038_v18  ;;  %v1684_v18 = vld [vmem:[#allocation6 + $0x230] ss:$8 sps:$4 sm:$0xff]  }
 0x1be   :  { %1100 = vmatpush1.bf16.msra.mxu1 %v2048_v62 }
 0x254   :  { %v555_v4 = vpop.f32.mrb[4].mxu1 }
 0x255   :  { %v2150_v8 = vmax.f32 %v555_v4, 0.0  ;;  %v557_v9 = vpop.f32.mrb[5].mxu1  ;;  %v1719_v4 = vld [vmem:[#allocation6 + $0x2e4] ss:$8 sps:$4 sm:$0xff]  }
 0x256   :  { %v563_v14 = vmax.f32 %v557_v9, 0.0  ;;  %v559_v17 = vpop.f32.mrb[6].mxu1  ;;  %v1717_v9 = vld [vmem:[#allocation6 + $0x2e0] ss:$8 sps:$4 sm:$0xff]  }
 0x257   :  { %vm564_vm2 = vcmp.gt.f32.partialorder %v2150_v8, 0.0  ;;  %v560_v23 = vpop.f32.mrb[7].mxu1  ;;  %v1720_v17 = vld [vmem:[#allocation6 + $0x2f0] ss:$8 sps:$4 sm:$0xff]  }
 0x258   :  { %v1466_v24 = vsel %vm564_vm2, 1.0, %v1800_v28  ;;  %vm565_vm3 = vcmp.gt.f32.partialorder %v563_v14, 0.0  ;;  %v593_v5 = vpack.c.bf16 %v563_v14, %v563_v14  ;;  %v1722_v14 = vld [vmem:[#allocation6 + $0x2f4] ss:$8 sps:$4 sm:$0xff]   ;;  %v592_v23 = vpack.c.bf16 %v2150_v8, %v2150_v8 }
 0x259   :  { %v1467_v29 = vsel %vm565_vm3, 1.0, %v1800_v28  ;;  %v1699_v28 = vld [vmem:[#allocation6 + $0x280] ss:$8 sps:$4 sm:$0xff]  }
 0x25a   :  { %v1468_v30 = vpack.c.bf16 %v1467_v29, %v1466_v24 }
 0x25c   :  { %v581_v35 = vrot.slane %v1468_v30, %v1873_v12  ;;  %v1111_v12 = vunpack.c.l.bf16 %v1110_v51 }
 0x25e   :  { %1469 = vst.sshfl [vmem:[#allocation2 + $0x2] sm:$0x5 pattern:$0x73625140] %v581_v35  ;;  %v1119_v52 = vrot.slane %v1111_v12, %v868_v43 }
 0x260   :  { %v1120_v54 = vcombine.high %v1119_v52, %v1119_v52 }
 0x265   :  { %v860_v40 = vld [vmem:[#allocation2 + $0x2] sm:$0x3] }
 0x266   :  { %v861_v41 = vunpack.c.l.bf16 %v860_v40 }
 0x268   :  { %v869_v44 = vrot.slane %v861_v41, %v868_v43 }
 0x26a   :  { %v870_v45 = vcombine.high %v869_v44, %v869_v44  ;;  %v873_v46 = vmul.f32 %v869_v44, %v853_v0  ;;  %v1713_v0 = vld [vmem:[#allocation6 + $0x2c4] ss:$8 sps:$4 sm:$0xff]  }
 0x26c   :  { %v874_v47 = vmul.f32 %v870_v45, %v855_v1  ;;  %v875_v49 = vpack.c.bf16 %v873_v46, %v873_v46  ;;  %v1711_v1 = vld [vmem:[#allocation6 + $0x2c0] ss:$8 sps:$4 sm:$0xff]  }
 0x26e   :  { %v876_v48 = vpack.c.bf16 %v874_v47, %v874_v47 }
 0x270   :  { %1101 = vmatprep.mubr.bf16.mxu1 %v876_v48 }
 0x271   :  { %1102 = vmatmul.mubr.bf16.vlgmr.msra.gmra.mrb[8].mxu1 %v875_v49 }
 0x344   :  { %v1103_v53 = vpop.f32.mrb[8].mxu1 }
 0x345   :  { %v1123_v55 = vmul.f32 %v1119_v52, %v1103_v53  ;;  %v1105_v56 = vpop.f32.mrb[9].mxu1 }
 0x346   :  { %v1124_v57 = vmul.f32 %v1120_v54, %v1105_v56  ;;  %v1107_v58 = vpop.f32.mrb[10].mxu1 }
 0x347   :  { %v1108_v59 = vpop.f32.mrb[11].mxu1  ;;  %v1125_v62 = vpack.c.bf16 %v1123_v55, %v1123_v55 }
 0x348   :  { %v1126_v60 = vpack.c.bf16 %v1124_v57, %v1124_v57 }
 0x34a   :  { %1159 = vmatprep.mubr.bf16.mxu0 %v1126_v60 }
 0x34b   :  { %1160 = vmatmul.mubr.bf16.vlgmr.msra.gmra.mrb[4].mxu0 %v1125_v62 }
 0x34c   :  { %1329 = vmatpush1.bf16.xpose.msra.mxu0 %v1675_v61  ;;  %1360 = vmatprep.mubr.bf16.mxu0 %v593_v5 }
 0x34d   :  { %1330 = vmatprep.subr.bf16.mxu0 %v1680_v63 }
 0x354   :  { %1331 = vmatpush1.bf16.xpose.msra.mxu0 %v1678_v6 }
 0x355   :  { %1332 = vmatprep.subr.bf16.mxu0 %v1683_v7 }
 0x35c   :  { %1333 = vmatpush1.bf16.xpose.msra.mxu0 %v1681_v10 }
 0x35d   :  { %1334 = vmatprep.subr.bf16.mxu0 %v1686_v15 }
 0x364   :  { %1335 = vmatpush1.bf16.xpose.msra.mxu0 %v1684_v18 }
 0x365   :  { %1336 = vmatprep.subr.bf16.mxu0 %v1689_v13 }
 0x36c   :  { %1337 = vmatpush1.bf16.xpose.msra.mxu0 %v1687_v16 }
 0x36d   :  { %1338 = vmatprep.subr.bf16.mxu0 %v1692_v19 }
 0x374   :  { %1339 = vmatpush1.bf16.xpose.msra.mxu0 %v1690_v20 }
 0x375   :  { %1340 = vmatprep.subr.bf16.mxu0 %v1695_v21 }
 0x37c   :  { %1341 = vmatpush1.bf16.xpose.msra.mxu0 %v1693_v22 }
 0x37d   :  { %1342 = vmatprep.subr.bf16.mxu0 %v1698_v25 }
 0x384   :  { %1343 = vmatpush1.bf16.xpose.msra.mxu0 %v1696_v26 }
 0x385   :  { %1344 = vmatprep.subr.bf16.mxu0 %v1701_v27 }
 0x38c   :  { %1345 = vmatpush1.bf16.xpose.msra.mxu0 %v1699_v28 }
 0x38d   :  { %1346 = vmatprep.subr.bf16.mxu0 %v1704_v31 }
 0x394   :  { %1347 = vmatpush1.bf16.xpose.msra.mxu0 %v1702_v32 }
 0x395   :  { %1348 = vmatprep.subr.bf16.mxu0 %v1707_v33 }
 0x39c   :  { %1349 = vmatpush1.bf16.xpose.msra.mxu0 %v1705_v34 }
 0x39d   :  { %1350 = vmatprep.subr.bf16.mxu0 %v1710_v37 }
 0x3a4   :  { %1351 = vmatpush1.bf16.xpose.msra.mxu0 %v1708_v11 }
 0x3a5   :  { %1352 = vmatprep.subr.bf16.mxu0 %v1713_v0 }
 0x3ac   :  { %1353 = vmatpush1.bf16.xpose.msra.mxu0 %v1711_v1 }
 0x3ad   :  { %1354 = vmatprep.subr.bf16.mxu0 %v1716_v2 }
 0x3b4   :  { %1355 = vmatpush1.bf16.xpose.msra.mxu0 %v1714_v3 }
 0x3b5   :  { %1356 = vmatprep.subr.bf16.mxu0 %v1719_v4 }
 0x3bc   :  { %1357 = vmatpush1.bf16.xpose.msra.mxu0 %v1717_v9 }
 0x3bd   :  { %1358 = vmatprep.subr.bf16.mxu0 %v1722_v14 }
 0x3c4   :  { %1359 = vmatpush1.bf16.xpose.msra.mxu0 %v1720_v17 }
 0x3cb   :  { %1361 = vmatmul.mubr.bf16.vlgmr.msra.gmra.mrb[4].mxu0 %v592_v23 }
 0x49e   :  { %v1362_v24 = vpop.f32.mrb[4].mxu0 }
 0x49f   :  { %v1364_v29 = vpop.f32.mrb[5].mxu0 }
 0x4a0   :  { %v1371_v30 = vcombine.low %v1362_v24, %v1364_v29  ;;  %v1366_v35 = vpop.f32.mrb[6].mxu0 }
 0x4a1   :  { %v1367_v36 = vpop.f32.mrb[7].mxu0 }
 0x4a2   :  { %1566 = vst.sshfl [vmem:[#allocation8] sm:$0x33 pattern:$0x76325410] %v1371_v30 }
 0x4a3   :  { %1778 = shalt.err (!%p1775_p6)
}
 0x4a4   :  { %s1779_s10 = scalar_lea.hbm %s2171_s2, 64 }
 0x4a5   :  { %p1780_p7 = scmp.ne.s32.totalorder %s2171_s2, %s1779_s10  ;;  %p1783_p8 = scmp.lt.u32.totalorder %s1779_s10, %s2171_s2 }
 0x4a7   :  { %p1785_p9 = pnand %p1783_p8, %p1780_p7 }
 0x4a9   :  { %1788 = shalt.err (!%p1785_p9)
}
 0x4aa   :  { %1390 = dma.vmem_to_hbm [thread:$0]  %s1388_s6, 64, %s2171_s2, [#allocation5]  }
 0x4ab   :  { %1793 = dma.done.wait [#allocation5], 64  }
 0x4ac   :  { %1794 = vsyncadd [#allocation5], 4294967232 }
 0x4ad   :  { %1394 = vsyncpa [#allocation4], 1 }
 0x4ae   :  { %1395 = vsyncpa [#allocation7], 1 }
 0x4af   :  { %1396 = vsyncpa [#allocation5], 1 }

</bundles_post_ra>
